<compile_context>
chip_gen: v7x
topology: tpu7x:2x2x1
jax: 0.10.0
libtpu: 0.0.40
codegen_flags: <defaults>
</compile_context>

<pallas_src>
import jax
import jax.numpy as jnp
from jax.experimental import pallas as pl
from jax.experimental.pallas import tpu as pltpu

# ---- model hyper-parameters (small, consistent with the module) ----
VOCAB_SIZE = 64
LABELS_SIZE = 8
EMBED_DIM = 32
KERNEL_SIZES = (1, 3, 5)
NUM_CHANNELS = (32, 32, 32)
K_MAX = max(KERNEL_SIZES)
C_TOTAL = sum(NUM_CHANNELS)

SEQ_LEN = 16
BATCH = 32          # grid = (BATCH // TILE_B,) = (2,): even -> both v7x TCs used
TILE_B = 16         # sequences per grid step; multiple of 8 (sublane-aligned output)
R_TILE = TILE_B * SEQ_LEN          # 256 matmul rows per grid step
PAD_TAIL = 8        # zero tail rows in the staging scratch (>= K_MAX - 1, multiple of 8)


def textcnn_kernel(tok_ref, table_ref, wtap_ref, bconv_ref, dec_w_ref, dec_b_ref,
                   mask_ref, out_ref, emb_scr):
    """One grid step = TILE_B sequences, whole forward in VMEM.

    tok_ref  : (R, 1)                 int32 flattened token ids for this tile
    table_ref: (VOCAB, E)             bf16  embedding table
    wtap_ref : (K_MAX, E, C_TOTAL)    bf16  per-tap fused conv weight (zeros for t >= k)
    bconv_ref: (1, C_TOTAL)           f32   concatenated conv bias
    dec_w_ref: (C_TOTAL, LABELS)      bf16  decoder weight (transposed vs nn.Linear)
    dec_b_ref: (1, LABELS)            f32   decoder bias
    mask_ref : (R, C_TOTAL)           f32   1.0 where position < L - k + 1, else 0.0
    out_ref  : (TILE_B, LABELS)       f32
    emb_scr  : (R + PAD_TAIL, E)      f32   VMEM staging scratch (zero tail)
    """
    R = TILE_B * SEQ_LEN

    # 1) Embedding lookup as a one-hot matmul (gather stays inside the kernel).
    #    onehot entries are exact in bf16, so emb == bf16 table rows exactly.
    ids = tok_ref[...]                                                    # (R, 1) i32
    vocab_iota = jax.lax.broadcasted_iota(jnp.int32, (R, VOCAB_SIZE), 1)  # (R, V)
    onehot = (vocab_iota == ids).astype(jnp.bfloat16)                     # (R, V)
    emb = jnp.dot(onehot, table_ref[...],
                  preferred_element_type=jnp.float32)                     # (R, E) f32

    # 2) Stage embeddings with a zero tail so the shifted per-tap reads stay finite
    #    (overflow rows are masked post-ReLU; zeros keep them NaN/Inf-free).
    emb_scr[0:R, :] = emb
    emb_scr[R:R + PAD_TAIL, :] = jnp.zeros((PAD_TAIL, EMBED_DIM), jnp.float32)

    # 3) Conv: per-tap row-shifted matmul, f32 accumulation (no im2col concat).
    acc = jnp.zeros((R, C_TOTAL), jnp.float32)
    for t in range(K_MAX):                                  # static unroll, K_MAX = 5
        sl = emb_scr[t:t + R, :]                            # (R, E) f32, bf16-exact
        acc = acc + jnp.dot(sl.astype(jnp.bfloat16), wtap_ref[t],
                            preferred_element_type=jnp.float32)
    conv = jnp.maximum(acc + bconv_ref[...], 0.0)           # (R, C_TOTAL) f32, >= 0

    # 4) Zero-mask invalid positions (safe post-ReLU) and dense global max pool.
    conv = conv * mask_ref[...]                              # (R, C_TOTAL)
    feat = jnp.max(conv.reshape(TILE_B, SEQ_LEN, C_TOTAL), axis=1)   # (TILE_B, C_TOTAL)

    # 5) Decoder (dropout = identity in eval mode): one small matmul.
    out_ref[...] = (jnp.dot(feat.astype(jnp.bfloat16), dec_w_ref[...],
                            preferred_element_type=jnp.float32) + dec_b_ref[...])


def textcnn_forward(tokens, fparams):
    """tokens: (B, L) int32.  fparams: fused params from fuse_params()."""
    B, L = tokens.shape
    assert L == SEQ_LEN and B % TILE_B == 0 and TILE_B % 8 == 0
    nb = B // TILE_B
    tok = tokens.reshape(B * L, 1).astype(jnp.int32)

    cost = pl.CostEstimate(
        flops=2 * B * L * (VOCAB_SIZE * EMBED_DIM + K_MAX * EMBED_DIM * C_TOTAL)
              + 2 * B * C_TOTAL * LABELS_SIZE,
        transcendentals=0,
        bytes_accessed=4 * B * L + 4 * B * LABELS_SIZE
              + 2 * (VOCAB_SIZE * EMBED_DIM + K_MAX * EMBED_DIM * C_TOTAL
                     + C_TOTAL * LABELS_SIZE)
              + 4 * (C_TOTAL + LABELS_SIZE + R_TILE * C_TOTAL),
    )

    return pl.pallas_call(
        textcnn_kernel,
        out_shape=jax.ShapeDtypeStruct((B, LABELS_SIZE), jnp.float32),
        grid=(nb,),
        in_specs=[
            pl.BlockSpec((R_TILE, 1), lambda i: (i, 0)),                      # tokens
            pl.BlockSpec((VOCAB_SIZE, EMBED_DIM), lambda i: (0, 0)),          # emb table
            pl.BlockSpec((K_MAX, EMBED_DIM, C_TOTAL), lambda i: (0, 0, 0)),   # conv taps
            pl.BlockSpec((1, C_TOTAL), lambda i: (0, 0)),                     # conv bias
            pl.BlockSpec((C_TOTAL, LABELS_SIZE), lambda i: (0, 0)),           # decoder W
            pl.BlockSpec((1, LABELS_SIZE), lambda i: (0, 0)),                 # decoder b
            pl.BlockSpec((R_TILE, C_TOTAL), lambda i: (0, 0)),                # pool mask
        ],
        out_specs=pl.BlockSpec((TILE_B, LABELS_SIZE), lambda i: (i, 0)),
        scratch_shapes=[pltpu.VMEM((R_TILE + PAD_TAIL, EMBED_DIM), jnp.float32)],
        compiler_params=pltpu.CompilerParams(dimension_semantics=("parallel",)),
        cost_estimate=cost,
    )(tok, fparams["embedding"], fparams["w_tap"], fparams["b_conv"],
      fparams["dec_w"], fparams["dec_b"], fparams["pool_mask"])


textcnn_forward = jax.jit(textcnn_forward)


def init_params(key):
    keys = jax.random.split(key, 9)
    params = {}
    params["embedding"] = jax.random.normal(keys[0], (VOCAB_SIZE, EMBED_DIM), jnp.float32) * 0.1
    conv_w, conv_b = [], []
    for i, (c, k) in enumerate(zip(NUM_CHANNELS, KERNEL_SIZES)):
        # stored as (k, E, C_out) == transpose of PyTorch Conv1d weight (C_out, E, k)
        conv_w.append(jax.random.normal(keys[1 + i], (k, EMBED_DIM, c), jnp.float32) * 0.1)
        conv_b.append(jax.random.normal(keys[4 + i], (1, c), jnp.float32) * 0.1)
    params["conv_w"] = conv_w
    params["conv_b"] = conv_b
    # stored as (sum(C), labels) == transpose of nn.Linear weight (labels, sum(C))
    params["dec_w"] = jax.random.normal(keys[7], (C_TOTAL, LABELS_SIZE), jnp.float32) * 0.1
    params["dec_b"] = jax.random.normal(keys[8], (1, LABELS_SIZE), jnp.float32) * 0.1
    return params


def fuse_params(params):
    """One-time parameter prep: bf16 weights, per-tap fused conv weight, pool mask."""
    # (K_MAX, E, C_TOTAL): tap t / branch i block = conv_w[i][t] if t < k_i else zeros.
    taps = []
    for t in range(K_MAX):
        cols = []
        for w, k in zip(params["conv_w"], KERNEL_SIZES):
            c = w.shape[-1]
            cols.append(w[t] if t < k else jnp.zeros((EMBED_DIM, c), jnp.float32))
        taps.append(jnp.concatenate(cols, axis=1))                    # (E, C_TOTAL)
    w_tap = jnp.stack(taps, axis=0).astype(jnp.bfloat16)              # (K_MAX, E, C_TOTAL)
    b_conv = jnp.concatenate(params["conv_b"], axis=1)                # (1, C_TOTAL) f32

    # Grid-invariant valid-position mask: 1.0 where (row % SEQ_LEN) < L - k + 1.
    pos = jnp.arange(R_TILE, dtype=jnp.int32) % SEQ_LEN               # (R,)
    lout = jnp.concatenate(
        [jnp.full((c,), SEQ_LEN - k + 1, jnp.int32)
         for c, k in zip(NUM_CHANNELS, KERNEL_SIZES)])                # (C_TOTAL,)
    pool_mask = (pos[:, None] < lout[None, :]).astype(jnp.float32)    # (R, C_TOTAL)

    return {
        "embedding": params["embedding"].astype(jnp.bfloat16),
        "w_tap": w_tap,
        "b_conv": b_conv,
        "dec_w": params["dec_w"].astype(jnp.bfloat16),
        "dec_b": params["dec_b"],
        "pool_mask": pool_mask,
    }


def reference_forward(tokens, params):
    """Pure-JAX f32 reference replicating the PyTorch forward (dropout = identity)."""
    emb = params["embedding"][tokens]                           # (B, L, E)
    feats = []
    for w, b, k in zip(params["conv_w"], params["conv_b"], KERNEL_SIZES):
        l_out = emb.shape[1] - k + 1
        acc = jnp.zeros((emb.shape[0], l_out, w.shape[-1]), jnp.float32)
        for t in range(k):
            acc = acc + jnp.einsum("ble,ec->blc", emb[:, t:t + l_out, :], w[t])
        acc = jax.nn.relu(acc + b[None, :, :])
        feats.append(jnp.max(acc, axis=1))
    enc = jnp.concatenate(feats, axis=1)
    return enc @ params["dec_w"] + params["dec_b"]


if __name__ == "__main__":
    key = jax.random.PRNGKey(0)
    pkey, tkey = jax.random.split(key)
    params = init_params(pkey)
    fused = fuse_params(params)
    tokens = jax.random.randint(tkey, (BATCH, SEQ_LEN), 0, VOCAB_SIZE, dtype=jnp.int32)

    out = jax.block_until_ready(textcnn_forward(tokens, fused))
    ref = jax.block_until_ready(reference_forward(tokens, params))

    assert out.shape == (BATCH, LABELS_SIZE)
    # Tolerance covers bf16 storage of weights/activations fed to the MXU (f32 accumulate)
    # vs the pure-f32 reference; estimated worst-case numeric drift is a few 1e-3, while
    # real layout/mask/shift bugs produce O(0.1) errors.
    assert jnp.allclose(out, ref, atol=1e-2, rtol=1e-2), "mismatch vs reference"
    print("KERNEL_OK")
</pallas_src>

<mosaic_0001>
module attributes {stable_mosaic.version = 11 : i64} {
  func.func @textcnn_kernel(%arg0: i32, %arg1: memref<256x1xi32, #tpu.memory_space<vmem>>, %arg2: memref<64x32xbf16, #tpu.memory_space<vmem>>, %arg3: memref<5x32x96xbf16, #tpu.memory_space<vmem>>, %arg4: memref<1x96xf32, #tpu.memory_space<vmem>>, %arg5: memref<96x8xbf16, #tpu.memory_space<vmem>>, %arg6: memref<1x8xf32, #tpu.memory_space<vmem>>, %arg7: memref<256x96xf32, #tpu.memory_space<vmem>>, %arg8: memref<16x8xf32, #tpu.memory_space<vmem>>, %arg9: memref<264x32xf32, #tpu.memory_space<vmem>>) attributes {dimension_semantics = [#tpu.dimension_semantics<parallel>], iteration_bounds = array<i64: 2>, scalar_prefetch = 0 : i64, scratch_operands = 1 : i64, tpu.core_type = #tpu.core_type<tc>, window_params = [{transform_indices = @transform_0, window_bounds = array<i64: 256, 1>}, {pipeline_mode = #tpu.pipeline_mode<synchronous>, transform_indices = @transform_1, window_bounds = array<i64: 64, 32>}, {pipeline_mode = #tpu.pipeline_mode<synchronous>, transform_indices = @transform_2, window_bounds = array<i64: 5, 32, 96>}, {pipeline_mode = #tpu.pipeline_mode<synchronous>, transform_indices = @transform_3, window_bounds = array<i64: 1, 96>}, {pipeline_mode = #tpu.pipeline_mode<synchronous>, transform_indices = @transform_4, window_bounds = array<i64: 96, 8>}, {pipeline_mode = #tpu.pipeline_mode<synchronous>, transform_indices = @transform_5, window_bounds = array<i64: 1, 8>}, {pipeline_mode = #tpu.pipeline_mode<synchronous>, transform_indices = @transform_6, window_bounds = array<i64: 256, 96>}, {transform_indices = @transform_7, window_bounds = array<i64: 16, 8>}]} {
    %c0 = arith.constant 0 : index
    %c0_0 = arith.constant 0 : index
    %0 = vector.load %arg1[%c0, %c0_0] : memref<256x1xi32, #tpu.memory_space<vmem>>, vector<256x1xi32>
    %1 = tpu.iota {dimensions = array<i32: 1>} : vector<256x64xi32>
    %2 = vector.broadcast %0 : vector<256x1xi32> to vector<256x64xi32>
    %3 = arith.cmpi eq, %1, %2 : vector<256x64xi32>
    %4 = arith.extui %3 : vector<256x64xi1> to vector<256x64xi32>
    %5 = arith.sitofp %4 : vector<256x64xi32> to vector<256x64xf32>
    %6 = arith.truncf %5 : vector<256x64xf32> to vector<256x64xbf16>
    %c0_1 = arith.constant 0 : index
    %c0_2 = arith.constant 0 : index
    %7 = vector.load %arg2[%c0_1, %c0_2] : memref<64x32xbf16, #tpu.memory_space<vmem>>, vector<64x32xbf16>
    %cst = arith.constant dense<0.000000e+00> : vector<256x32xf32>
    %8 = tpu.matmul %6, %7, %cst {dimension_numbers = #tpu.dot_dimension_numbers<[1], [0], [0], [1], [0, 0, 1, 1], [], []>} : vector<256x64xbf16>, vector<64x32xbf16>, vector<256x32xf32> -> vector<256x32xf32>
    %c0_3 = arith.constant 0 : index
    %c0_4 = arith.constant 0 : index
    %9 = vector.load %arg9[%c0_3, %c0_4] : memref<264x32xf32, #tpu.memory_space<vmem>>, vector<256x32xf32>
    tpu.vector_store %arg9[%c0_3, %c0_4], %8 {strides = array<i32>} : memref<264x32xf32, #tpu.memory_space<vmem>>, vector<256x32xf32>,
    %cst_5 = arith.constant 0.000000e+00 : f32
    %10 = vector.broadcast %cst_5 : f32 to vector<8x32xf32>
    %c256 = arith.constant 256 : index
    %c0_6 = arith.constant 0 : index
    %11 = vector.load %arg9[%c256, %c0_6] : memref<264x32xf32, #tpu.memory_space<vmem>>, vector<8x32xf32>
    tpu.vector_store %arg9[%c256, %c0_6], %10 {strides = array<i32>} : memref<264x32xf32, #tpu.memory_space<vmem>>, vector<8x32xf32>,
    %cst_7 = arith.constant 0.000000e+00 : f32
    %12 = vector.broadcast %cst_7 : f32 to vector<256x96xf32>
    %c0_8 = arith.constant 0 : index
    %c0_9 = arith.constant 0 : index
    %13 = vector.load %arg9[%c0_8, %c0_9] : memref<264x32xf32, #tpu.memory_space<vmem>>, vector<256x32xf32>
    %14 = arith.truncf %13 : vector<256x32xf32> to vector<256x32xbf16>
    %c0_10 = arith.constant 0 : index
    %c0_11 = arith.constant 0 : index
    %c0_12 = arith.constant 0 : index
    %15 = vector.load %arg3[%c0_10, %c0_11, %c0_12] : memref<5x32x96xbf16, #tpu.memory_space<vmem>>, vector<1x32x96xbf16>
    %16 = vector.shape_cast %15 : vector<1x32x96xbf16> to vector<32x96xbf16>
    %cst_13 = arith.constant dense<0.000000e+00> : vector<256x96xf32>
    %17 = tpu.matmul %14, %16, %cst_13 {dimension_numbers = #tpu.dot_dimension_numbers<[1], [0], [0], [1], [0, 0, 1, 1], [], []>} : vector<256x32xbf16>, vector<32x96xbf16>, vector<256x96xf32> -> vector<256x96xf32>
    %18 = arith.addf %12, %17 : vector<256x96xf32>
    %c1 = arith.constant 1 : index
    %c0_14 = arith.constant 0 : index
    %19 = vector.load %arg9[%c1, %c0_14] : memref<264x32xf32, #tpu.memory_space<vmem>>, vector<256x32xf32>
    %20 = arith.truncf %19 : vector<256x32xf32> to vector<256x32xbf16>
    %c1_15 = arith.constant 1 : index
    %c0_16 = arith.constant 0 : index
    %c0_17 = arith.constant 0 : index
    %21 = vector.load %arg3[%c1_15, %c0_16, %c0_17] : memref<5x32x96xbf16, #tpu.memory_space<vmem>>, vector<1x32x96xbf16>
    %22 = vector.shape_cast %21 : vector<1x32x96xbf16> to vector<32x96xbf16>
    %cst_18 = arith.constant dense<0.000000e+00> : vector<256x96xf32>
    %23 = tpu.matmul %20, %22, %cst_18 {dimension_numbers = #tpu.dot_dimension_numbers<[1], [0], [0], [1], [0, 0, 1, 1], [], []>} : vector<256x32xbf16>, vector<32x96xbf16>, vector<256x96xf32> -> vector<256x96xf32>
    %24 = arith.addf %18, %23 : vector<256x96xf32>
    %c2 = arith.constant 2 : index
    %c0_19 = arith.constant 0 : index
    %25 = vector.load %arg9[%c2, %c0_19] : memref<264x32xf32, #tpu.memory_space<vmem>>, vector<256x32xf32>
    %26 = arith.truncf %25 : vector<256x32xf32> to vector<256x32xbf16>
    %c2_20 = arith.constant 2 : index
    %c0_21 = arith.constant 0 : index
    %c0_22 = arith.constant 0 : index
    %27 = vector.load %arg3[%c2_20, %c0_21, %c0_22] : memref<5x32x96xbf16, #tpu.memory_space<vmem>>, vector<1x32x96xbf16>
    %28 = vector.shape_cast %27 : vector<1x32x96xbf16> to vector<32x96xbf16>
    %cst_23 = arith.constant dense<0.000000e+00> : vector<256x96xf32>
    %29 = tpu.matmul %26, %28, %cst_23 {dimension_numbers = #tpu.dot_dimension_numbers<[1], [0], [0], [1], [0, 0, 1, 1], [], []>} : vector<256x32xbf16>, vector<32x96xbf16>, vector<256x96xf32> -> vector<256x96xf32>
    %30 = arith.addf %24, %29 : vector<256x96xf32>
    %c3 = arith.constant 3 : index
    %c0_24 = arith.constant 0 : index
    %31 = vector.load %arg9[%c3, %c0_24] : memref<264x32xf32, #tpu.memory_space<vmem>>, vector<256x32xf32>
    %32 = arith.truncf %31 : vector<256x32xf32> to vector<256x32xbf16>
    %c3_25 = arith.constant 3 : index
    %c0_26 = arith.constant 0 : index
    %c0_27 = arith.constant 0 : index
    %33 = vector.load %arg3[%c3_25, %c0_26, %c0_27] : memref<5x32x96xbf16, #tpu.memory_space<vmem>>, vector<1x32x96xbf16>
    %34 = vector.shape_cast %33 : vector<1x32x96xbf16> to vector<32x96xbf16>
    %cst_28 = arith.constant dense<0.000000e+00> : vector<256x96xf32>
    %35 = tpu.matmul %32, %34, %cst_28 {dimension_numbers = #tpu.dot_dimension_numbers<[1], [0], [0], [1], [0, 0, 1, 1], [], []>} : vector<256x32xbf16>, vector<32x96xbf16>, vector<256x96xf32> -> vector<256x96xf32>
    %36 = arith.addf %30, %35 : vector<256x96xf32>
    %c4 = arith.constant 4 : index
    %c0_29 = arith.constant 0 : index
    %37 = vector.load %arg9[%c4, %c0_29] : memref<264x32xf32, #tpu.memory_space<vmem>>, vector<256x32xf32>
    %38 = arith.truncf %37 : vector<256x32xf32> to vector<256x32xbf16>
    %c4_30 = arith.constant 4 : index
    %c0_31 = arith.constant 0 : index
    %c0_32 = arith.constant 0 : index
    %39 = vector.load %arg3[%c4_30, %c0_31, %c0_32] : memref<5x32x96xbf16, #tpu.memory_space<vmem>>, vector<1x32x96xbf16>
    %40 = vector.shape_cast %39 : vector<1x32x96xbf16> to vector<32x96xbf16>
    %cst_33 = arith.constant dense<0.000000e+00> : vector<256x96xf32>
    %41 = tpu.matmul %38, %40, %cst_33 {dimension_numbers = #tpu.dot_dimension_numbers<[1], [0], [0], [1], [0, 0, 1, 1], [], []>} : vector<256x32xbf16>, vector<32x96xbf16>, vector<256x96xf32> -> vector<256x96xf32>
    %42 = arith.addf %36, %41 : vector<256x96xf32>
    %c0_34 = arith.constant 0 : index
    %c0_35 = arith.constant 0 : index
    %43 = vector.load %arg4[%c0_34, %c0_35] : memref<1x96xf32, #tpu.memory_space<vmem>>, vector<1x96xf32>
    %44 = vector.broadcast %43 : vector<1x96xf32> to vector<256x96xf32>
    %45 = arith.addf %42, %44 : vector<256x96xf32>
    %cst_36 = arith.constant 0.000000e+00 : f32
    %46 = vector.broadcast %cst_36 : f32 to vector<256x96xf32>
    %47 = arith.maximumf %45, %46 : vector<256x96xf32>
    %c0_37 = arith.constant 0 : index
    %c0_38 = arith.constant 0 : index
    %48 = vector.load %arg7[%c0_37, %c0_38] : memref<256x96xf32, #tpu.memory_space<vmem>>, vector<256x96xf32>
    %49 = arith.mulf %47, %48 : vector<256x96xf32>
    %50 = vector.shape_cast %49 : vector<256x96xf32> to vector<16x16x96xf32>
    %cst_39 = arith.constant dense<0xFF800000> : vector<16x96xf32>
    %51 = vector.multi_reduction <maximumf>, %50, %cst_39 [1] : vector<16x16x96xf32> to vector<16x96xf32>
    %52 = arith.truncf %51 : vector<16x96xf32> to vector<16x96xbf16>
    %c0_40 = arith.constant 0 : index
    %c0_41 = arith.constant 0 : index
    %53 = vector.load %arg5[%c0_40, %c0_41] : memref<96x8xbf16, #tpu.memory_space<vmem>>, vector<96x8xbf16>
    %cst_42 = arith.constant dense<0.000000e+00> : vector<16x8xf32>
    %54 = tpu.matmul %52, %53, %cst_42 {dimension_numbers = #tpu.dot_dimension_numbers<[1], [0], [0], [1], [0, 0, 1, 1], [], []>} : vector<16x96xbf16>, vector<96x8xbf16>, vector<16x8xf32> -> vector<16x8xf32>
    %c0_43 = arith.constant 0 : index
    %c0_44 = arith.constant 0 : index
    %55 = vector.load %arg6[%c0_43, %c0_44] : memref<1x8xf32, #tpu.memory_space<vmem>>, vector<1x8xf32>
    %56 = vector.broadcast %55 : vector<1x8xf32> to vector<16x8xf32>
    %57 = arith.addf %54, %56 : vector<16x8xf32>
    %c0_45 = arith.constant 0 : index
    %c0_46 = arith.constant 0 : index
    %58 = vector.load %arg8[%c0_45, %c0_46] : memref<16x8xf32, #tpu.memory_space<vmem>>, vector<16x8xf32>
    tpu.vector_store %arg8[%c0_45, %c0_46], %57 {strides = array<i32>} : memref<16x8xf32, #tpu.memory_space<vmem>>, vector<16x8xf32>,
    return
  }
  func.func @transform_0(%arg0: i32) -> (i32, i32) {
    %c0_i32 = arith.constant 0 : i32
    %c0_i32_0 = arith.constant 0 : i32
    return %arg0, %c0_i32 : i32, i32
  }
  func.func @transform_1(%arg0: i32) -> (i32, i32) {
    %c0_i32 = arith.constant 0 : i32
    %c0_i32_0 = arith.constant 0 : i32
    %c0_i32_1 = arith.constant 0 : i32
    return %c0_i32, %c0_i32_0 : i32, i32
  }
  func.func @transform_2(%arg0: i32) -> (i32, i32, i32) {
    %c0_i32 = arith.constant 0 : i32
    %c0_i32_0 = arith.constant 0 : i32
    %c0_i32_1 = arith.constant 0 : i32
    %c0_i32_2 = arith.constant 0 : i32
    return %c0_i32, %c0_i32_0, %c0_i32_1 : i32, i32, i32
  }
  func.func @transform_3(%arg0: i32) -> (i32, i32) {
    %c0_i32 = arith.constant 0 : i32
    %c0_i32_0 = arith.constant 0 : i32
    %c0_i32_1 = arith.constant 0 : i32
    return %c0_i32, %c0_i32_0 : i32, i32
  }
  func.func @transform_4(%arg0: i32) -> (i32, i32) {
    %c0_i32 = arith.constant 0 : i32
    %c0_i32_0 = arith.constant 0 : i32
    %c0_i32_1 = arith.constant 0 : i32
    return %c0_i32, %c0_i32_0 : i32, i32
  }
  func.func @transform_5(%arg0: i32) -> (i32, i32) {
    %c0_i32 = arith.constant 0 : i32
    %c0_i32_0 = arith.constant 0 : i32
    %c0_i32_1 = arith.constant 0 : i32
    return %c0_i32, %c0_i32_0 : i32, i32
  }
  func.func @transform_6(%arg0: i32) -> (i32, i32) {
    %c0_i32 = arith.constant 0 : i32
    %c0_i32_0 = arith.constant 0 : i32
    %c0_i32_1 = arith.constant 0 : i32
    return %c0_i32, %c0_i32_0 : i32, i32
  }
  func.func @transform_7(%arg0: i32) -> (i32, i32) {
    %c0_i32 = arith.constant 0 : i32
    %c0_i32_0 = arith.constant 0 : i32
    return %arg0, %c0_i32 : i32, i32
  }
}

</mosaic_0001>

<bundles_post_ra>
// kernel: textcnn_forward.1
= control target key start
LH: loop header
LB: loop body
LE: loop exit
PB: predicated region body
PF: predicated region fallthrough
CT: control target
= control target key end

     0   :  { %s3521_s24 = smov 0   ;;  %s4121_s0 = inlined_call_operand.vmem [shape: s32[512,1], index: 0, kind: input, shape index: {}]   ;;  %s4122_s1 = inlined_call_operand.vmem [shape: bf16[64,32], index: 1, kind: input, shape index: {}]   ;;  %s4123_s2 = inlined_call_operand.vmem [shape: bf16[5,32,96], index: 2, kind: input, shape index: {}]   ;;  %s4124_s3 = inlined_call_operand.vmem [shape: f32[1,96], index: 3, kind: input, shape index: {}]   ;;  %s4125_s4 = inlined_call_operand.vmem [shape: bf16[96,8], index: 4, kind: input, shape index: {}]   ;;  %s4126_s5 = inlined_call_operand.vmem [shape: f32[1,8], index: 5, kind: input, shape index: {}]   ;;  %s4127_s6 = inlined_call_operand.vmem [shape: f32[256,96], index: 6, kind: input, shape index: {}]   ;;  %s4128_s7 = inlined_call_operand.vmem [shape: f32[32,8], index: 7, kind: output, shape index: {}]  }
   0x1 LB: > { %s2774_s25 = sadd.s32 4294967295, %s3476_s24   ;;  %p2778_p0 = scmp.ge.s32.totalorder %s3476_s24, 1  ;;  %s3476_s24 = sphi %s3521_s24, %s17_s24  }
   0x2   : > { %p238_p1 = scmp.lt.s32.totalorder %s3476_s24, 3 }
   0x4   : > { %p239_p2 = pnand %p2778_p0, %p238_p1 }
   0x5   : > { %s2779_s26 = sshll.u32 (!%p239_p2), %s2774_s25, 5  ;;  %v3478_v0 = vmov (!%p239_p2), 0   ;;  %v3450_v1 = vld [vmem:[%s4122_s1] sm:$0xff] (!%p239_p2)   ;;  %v3451_v2 = vld [vmem:[%s4122_s1 + $0x8] sm:$0xff] (!%p239_p2)   ;;  %v3452_v11 = vld [vmem:[%s4122_s1 + $0x10] sm:$0xff] (!%p239_p2)   ;;  %v315_v37 = vlaneseq (!%p239_p2)  ;;  %vm557_vm4 = vcmask (!%p239_p2), 523264  }
   0x6   : > { %242 = sbr.rel (%p239_p2) target bundleno = 1105 (0x451), region = 48  ;;  %3449 = vset.pattern.permute.xlu1 (!%p239_p2), %v3478_v0  ;;  %3448 = vset.pattern.permute.xlu0 (!%p239_p2), %v3478_v0  ;;  %p271_p3 = scmp.lt.s32.totalorder (!%p239_p2), %s2779_s26, 63  ;;  %v3453_v12 = vld [vmem:[%s4122_s1 + $0x18] sm:$0xff] (!%p239_p2)   ;;  %v3479_v43 = vmov (!%p239_p2), 0.0  }
   0x7   : > { %3069 = vmatprep.subr.bf16.mxu0 (!%p239_p2), %v3450_v1  ;;  %v3580_v38 = vand.u32 (!%p239_p2), 127, %v315_v37  ;;  %s2781_s9 = sshll.u32 (!%p239_p2), %s2774_s25, 1 }
   0x8   : > { %3070 = vmatpush3.bf16.msra.mxu0 (!%p239_p2), %v3450_v1  ;;  %p277_p4 = scmp.lt.s32.totalorder (!%p239_p2), %s2781_s9, 3 }
   0x9   : > { %3071 = vmatprep.subr.bf16.mxu0 (!%p239_p2), %v3451_v2 }
   0xc   : > { %3072 = vmatpush3.bf16.msra.mxu0 (!%p239_p2), %v3451_v2 }
   0xd   : > { %s4130_s26 = smov (!%p271_p3, %s2779_s26), 63  ;;  %3073 = vmatprep.subr.bf16.mxu0 %v3452_v11  ;;  %s4132_s9 = smov (!%p277_p4, %s2781_s9), 3 }
   0xe   : > { %s2780_s8 = sshll.u32 %s4130_s26, 3  ;;  %s2782_s10 = sshll.u32 %s4132_s9, 3 }
   0xf   : > { %s3540_s11 = scalar_lea.vmem %s4121_s0, %s2780_s8  ;;  %s280_s15 = scalar_lea.vmem %s4128_s7, %s2782_s10 }
  0x10   : > { %v285_v3 = vld [vmem:[%s3540_s11 + $0x10] sm:$0xff]  ;;  %v283_v4 = vld [vmem:[%s3540_s11] sm:$0xff]  ;;  %v286_v5 = vld [vmem:[%s3540_s11 + $0x18] sm:$0xff]  ;;  %3074 = vmatpush3.bf16.msra.mxu0 %v3452_v11 }
  0x11   : > { %324 = vperm.xlu1 %3449, %v285_v3   ;;  %318 = vperm.xlu0 %3448, %v283_v4   ;;  %v284_v6 = vld [vmem:[%s3540_s11 + $0x8] sm:$0xff]  ;;  %v287_v8 = vld [vmem:[%s3540_s11 + $0x20] sm:$0xff]  ;;  %v290_v9 = vld [vmem:[%s3540_s11 + $0x38] sm:$0xff] }
  0x12   : > { %v288_v7 = vld [vmem:[%s3540_s11 + $0x28] sm:$0xff]  ;;  %v289_v10 = vld [vmem:[%s3540_s11 + $0x30] sm:$0xff]  ;;  %v291_v14 = vld [vmem:[%s3540_s11 + $0x40] sm:$0xff]  ;;  %3075 = vmatprep.subr.bf16.mxu0 %v3453_v12 }
  0x13   : > { %v292_v13 = vld [vmem:[%s3540_s11 + $0x48] sm:$0xff]  ;;  %v294_v15 = vld [vmem:[%s3540_s11 + $0x58] sm:$0xff]  ;;  %v293_v16 = vld [vmem:[%s3540_s11 + $0x50] sm:$0xff] }
  0x14   : > { %3076 = vmatpush3.bf16.msra.mxu0 %v3453_v12  ;;  %v296_v17 = vld [vmem:[%s3540_s11 + $0x68] sm:$0xff]  ;;  %v295_v18 = vld [vmem:[%s3540_s11 + $0x60] sm:$0xff]  ;;  %v298_v19 = vld [vmem:[%s3540_s11 + $0x78] sm:$0xff] }
  0x15   : > { %327 = vperm.xlu1 %3449, %v286_v5   ;;  %321 = vperm.xlu0 %3448, %v284_v6   ;;  %v297_v20 = vld [vmem:[%s3540_s11 + $0x70] sm:$0xff]  ;;  %v300_v21 = vld [vmem:[%s3540_s11 + $0x88] sm:$0xff]  ;;  %v299_v22 = vld [vmem:[%s3540_s11 + $0x80] sm:$0xff] }
  0x16   : > { %v302_v23 = vld [vmem:[%s3540_s11 + $0x98] sm:$0xff]  ;;  %v301_v24 = vld [vmem:[%s3540_s11 + $0x90] sm:$0xff]  ;;  %v304_v25 = vld [vmem:[%s3540_s11 + $0xa8] sm:$0xff] }
  0x17   : > { %v303_v26 = vld [vmem:[%s3540_s11 + $0xa0] sm:$0xff]  ;;  %v306_v27 = vld [vmem:[%s3540_s11 + $0xb8] sm:$0xff]  ;;  %v305_v28 = vld [vmem:[%s3540_s11 + $0xb0] sm:$0xff] }
  0x18   : > { %v308_v29 = vld [vmem:[%s3540_s11 + $0xc8] sm:$0xff]  ;;  %v307_v30 = vld [vmem:[%s3540_s11 + $0xc0] sm:$0xff]  ;;  %v310_v31 = vld [vmem:[%s3540_s11 + $0xd8] sm:$0xff] }
  0x19   : > { %333 = vperm.xlu1 %3449, %v288_v7   ;;  %330 = vperm.xlu0 %3448, %v287_v8   ;;  %v309_v32 = vld [vmem:[%s3540_s11 + $0xd0] sm:$0xff]  ;;  %v312_v33 = vld [vmem:[%s3540_s11 + $0xe8] sm:$0xff]  ;;  %v311_v34 = vld [vmem:[%s3540_s11 + $0xe0] sm:$0xff] }
  0x1a   : > { %v314_v35 = vld [vmem:[%s3540_s11 + $0xf8] sm:$0xff]  ;;  %v313_v36 = vld [vmem:[%s3540_s11 + $0xf0] sm:$0xff] }
  0x1d   : > { %339 = vperm.xlu1 %3449, %v290_v9   ;;  %336 = vperm.xlu0 %3448, %v289_v10  }
  0x21   : > { %345 = vperm.xlu1 %3449, %v292_v13   ;;  %342 = vperm.xlu0 %3448, %v291_v14  }
  0x25   : > { %351 = vperm.xlu1 %3449, %v294_v15   ;;  %348 = vperm.xlu0 %3448, %v293_v16  }
  0x29   : > { %357 = vperm.xlu1 %3449, %v296_v17   ;;  %354 = vperm.xlu0 %3448, %v295_v18  }
  0x2d   : > { %363 = vperm.xlu1 %3449, %v298_v19   ;;  %360 = vperm.xlu0 %3448, %v297_v20  }
  0x31   : > { %369 = vperm.xlu1 %3449, %v300_v21   ;;  %366 = vperm.xlu0 %3448, %v299_v22  }
  0x35   : > { %375 = vperm.xlu1 %3449, %v302_v23   ;;  %372 = vperm.xlu0 %3448, %v301_v24  }
  0x39   : > { %381 = vperm.xlu1 %3449, %v304_v25   ;;  %378 = vperm.xlu0 %3448, %v303_v26  }
  0x3d   : > { %387 = vperm.xlu1 %3449, %v306_v27   ;;  %384 = vperm.xlu0 %3448, %v305_v28  }
  0x41   : > { %393 = vperm.xlu1 %3449, %v308_v29   ;;  %390 = vperm.xlu0 %3448, %v307_v30  }
  0x45   : > { %399 = vperm.xlu1 %3449, %v310_v31   ;;  %396 = vperm.xlu0 %3448, %v309_v32  }
  0x49   : > { %405 = vperm.xlu1 %3449, %v312_v33   ;;  %402 = vperm.xlu0 %3448, %v311_v34  }
  0x4d   : > { %411 = vperm.xlu1 %3449, %v314_v35   ;;  %408 = vperm.xlu0 %3448, %v313_v36  }
  0x90   : > { %v325_v39 = vpop.permute.xlu1 %324  ;;  %v319_v40 = vpop.permute.xlu0 %318 }
  0x91   : > { %vm415_vm0 = vcmp.eq.s32.totalorder %v3580_v38, %v325_v39  ;;  %vm413_vm1 = vcmp.eq.s32.totalorder %v3580_v38, %v319_v40 }
  0x92   : > { %v2785_v44 = vsel %vm415_vm0, 1.0, %v3479_v43  ;;  %v2783_v45 = vsel %vm413_vm1, 1.0, %v3479_v43 }
  0x94   : > { %v328_v41 = vpop.permute.xlu1 %327  ;;  %v322_v42 = vpop.permute.xlu0 %321 }
  0x95   : > { %vm416_vm2 = vcmp.eq.s32.totalorder %v3580_v38, %v328_v41  ;;  %vm414_vm3 = vcmp.eq.s32.totalorder %v3580_v38, %v322_v42 }
  0x96   : > { %v2786_v46 = vsel %vm416_vm2, 1.0, %v3479_v43  ;;  %v2784_v47 = vsel %vm414_vm3, 1.0, %v3479_v43 }
  0x97   : > { %v510_v48 = vpack.c.bf16 %v2786_v46, %v2785_v44  ;;  %v509_v49 = vpack.c.bf16 %v2784_v47, %v2783_v45 }
  0x98   : > { %v334_v50 = vpop.permute.xlu1 %333  ;;  %v331_v51 = vpop.permute.xlu0 %330 }
  0x99   : > { %vm418_vm5 = vcmp.eq.s32.totalorder %v3580_v38, %v334_v50  ;;  %vm417_vm6 = vcmp.eq.s32.totalorder %v3580_v38, %v331_v51  ;;  %3077 = vmatprep.mubr.msk.bf16.mxu0 %vm557_vm4, %v509_v49 }
  0x9a   : > { %v2788_v52 = vsel %vm418_vm5, 1.0, %v3479_v43  ;;  %v2787_v53 = vsel %vm417_vm6, 1.0, %v3479_v43  ;;  %3078 = vmatmul.mubr.msk.bf16.vlgmr.msra.gmra.mrb[0].mxu0 %vm557_vm4, %v510_v48 }
  0x9b   : > { %v511_v54 = vpack.c.bf16 %v2788_v52, %v2787_v53 }
  0x9c   : > { %v340_v55 = vpop.permute.xlu1 %339  ;;  %v337_v56 = vpop.permute.xlu0 %336 }
  0x9d   : > { %vm420_vm7 = vcmp.eq.s32.totalorder %v3580_v38, %v340_v55  ;;  %vm419_vm8 = vcmp.eq.s32.totalorder %v3580_v38, %v337_v56  ;;  %3081 = vmatprep.mubr.msk.bf16.mxu0 %vm557_vm4, %v511_v54 }
  0x9e   : > { %v2790_v57 = vsel %vm420_vm7, 1.0, %v3479_v43  ;;  %v2789_v58 = vsel %vm419_vm8, 1.0, %v3479_v43 }
  0x9f   : > { %v512_v59 = vpack.c.bf16 %v2790_v57, %v2789_v58  ;;  %v3454_v58 = vld [vmem:[%s4123_s2 + $0x10] sm:$0xff]  }
  0xa0   : > { %v346_v60 = vpop.permute.xlu1 %345  ;;  %v343_v61 = vpop.permute.xlu0 %342  ;;  %3109 = vmatprep.subr.bf16.mxu0 %v3454_v58 }
  0xa1   : > { %vm422_vm9 = vcmp.eq.s32.totalorder %v3580_v38, %v346_v60  ;;  %vm421_vm10 = vcmp.eq.s32.totalorder %v3580_v38, %v343_v61  ;;  %3110 = vmatpush3.bf16.msra.mxu0 %v3454_v58  ;;  %v3457_v60 = vld [vmem:[%s4123_s2 + $0x8] sm:$0xff]   ;;  %v3679_v61 = vld [vmem:[%s4123_s2 + $0x20] sm:$0xff]  }
  0xa2   : > { %v2792_v62 = vsel %vm422_vm9, 1.0, %v3479_v43  ;;  %v2791_v63 = vsel %vm421_vm10, 1.0, %v3479_v43  ;;  %3082 = vmatmul.mubr.msk.bf16.gmra.mrb[4].mxu0 %vm557_vm4, %v512_v59  ;;  %v3456_v59 = vld [vmem:[%s4123_s2] sm:$0xff]  }
  0xa3   : > { %v513_v0 = vpack.c.bf16 %v2792_v62, %v2791_v63  ;;  %3305 = vmatprep.subr.bf16.mxu1 %v3456_v59 }
  0xa4   : > { %v352_v1 = vpop.permute.xlu1 %351  ;;  %v349_v2 = vpop.permute.xlu0 %348  ;;  %3307 = vmatpush3.bf16.msra.mxu1 %v3456_v59 }
  0xa5   : > { %vm424_vm11 = vcmp.eq.s32.totalorder %v3580_v38, %v352_v1  ;;  %vm423_vm12 = vcmp.eq.s32.totalorder %v3580_v38, %v349_v2  ;;  %3085 = vmatprep.mubr.msk.bf16.mxu0 %vm557_vm4, %v513_v0  ;;  %3306 = vmatprep.subr.bf16.mxu1 %v3457_v60 }
  0xa6   : > { %v2794_v3 = vsel %vm424_vm11, 1.0, %v3479_v43  ;;  %v2793_v4 = vsel %vm423_vm12, 1.0, %v3479_v43 }
  0xa7   : > { %v514_v5 = vpack.c.bf16 %v2794_v3, %v2793_v4 }
  0xa8   : > { %v358_v6 = vpop.permute.xlu1 %357  ;;  %v355_v7 = vpop.permute.xlu0 %354  ;;  %3308 = vmatpush3.bf16.msra.mxu1 %v3457_v60 }
  0xa9   : > { %vm426_vm13 = vcmp.eq.s32.totalorder %v3580_v38, %v358_v6  ;;  %vm425_vm14 = vcmp.eq.s32.totalorder %v3580_v38, %v355_v7  ;;  %3181 = vmatprep.subr.bf16.mxu1 %v3679_v61 }
  0xaa   : > { %v2796_v8 = vsel %vm426_vm13, 1.0, %v3479_v43  ;;  %v2795_v9 = vsel %vm425_vm14, 1.0, %v3479_v43  ;;  %3086 = vmatmul.mubr.msk.bf16.gmra.mrb[8].mxu0 %vm557_vm4, %v514_v5 }
  0xab   : > { %v515_v10 = vpack.c.bf16 %v2796_v8, %v2795_v9 }
  0xac   : > { %v364_v11 = vpop.permute.xlu1 %363  ;;  %v361_v12 = vpop.permute.xlu0 %360 }
  0xad   : > { %vm428_vm15 = vcmp.eq.s32.totalorder %v3580_v38, %v364_v11  ;;  %vm427_vm0 = vcmp.eq.s32.totalorder %v3580_v38, %v361_v12  ;;  %3089 = vmatprep.mubr.msk.bf16.mxu0 %vm557_vm4, %v515_v10 }
  0xae   : > { %v2798_v13 = vsel %vm428_vm15, 1.0, %v3479_v43  ;;  %v2797_v14 = vsel %vm427_vm0, 1.0, %v3479_v43 }
  0xaf   : > { %v516_v15 = vpack.c.bf16 %v2798_v13, %v2797_v14 }
  0xb0   : > { %v370_v16 = vpop.permute.xlu1 %369  ;;  %v367_v17 = vpop.permute.xlu0 %366 }
  0xb1   : > { %vm430_vm1 = vcmp.eq.s32.totalorder %v3580_v38, %v370_v16  ;;  %vm429_vm2 = vcmp.eq.s32.totalorder %v3580_v38, %v367_v17 }
  0xb2   : > { %v2800_v18 = vsel %vm430_vm1, 1.0, %v3479_v43  ;;  %v2799_v19 = vsel %vm429_vm2, 1.0, %v3479_v43  ;;  %3090 = vmatmul.mubr.msk.bf16.gmra.mrb[12].mxu0 %vm557_vm4, %v516_v15  ;;  %vm767_vm2 = vcmask 261120  }
  0xb3   : > { %v517_v20 = vpack.c.bf16 %v2800_v18, %v2799_v19  ;;  %800 = vst.msk [vmem:[#allocation2 + $0x100] sm:$0xff] %vm767_vm2, %v3479_v43 }
  0xb4   : > { %v376_v21 = vpop.permute.xlu1 %375  ;;  %v373_v22 = vpop.permute.xlu0 %372 }
  0xb5   : > { %vm432_vm3 = vcmp.eq.s32.totalorder %v3580_v38, %v376_v21  ;;  %vm431_vm5 = vcmp.eq.s32.totalorder %v3580_v38, %v373_v22  ;;  %3093 = vmatprep.mubr.msk.bf16.mxu0 %vm557_vm4, %v517_v20 }
  0xb6   : > { %v2802_v23 = vsel %vm432_vm3, 1.0, %v3479_v43  ;;  %v2801_v24 = vsel %vm431_vm5, 1.0, %v3479_v43  ;;  %vm2401_vm3 = vcmask 785408   ;;  %vm2613_vm5 = vcmask 1041409  }
  0xb7   : > { %v518_v25 = vpack.c.bf16 %v2802_v23, %v2801_v24 }
  0xb8   : > { %v382_v26 = vpop.permute.xlu1 %381  ;;  %v379_v27 = vpop.permute.xlu0 %378 }
  0xb9   : > { %vm434_vm6 = vcmp.eq.s32.totalorder %v3580_v38, %v382_v26  ;;  %vm433_vm7 = vcmp.eq.s32.totalorder %v3580_v38, %v379_v27 }
  0xba   : > { %v2804_v28 = vsel %vm434_vm6, 1.0, %v3479_v43  ;;  %v2803_v29 = vsel %vm433_vm7, 1.0, %v3479_v43  ;;  %3094 = vmatmul.mubr.msk.bf16.gmra.mrb[16].mxu0 %vm557_vm4, %v518_v25  ;;  %vm2615_vm6 = vcmask 1042434   ;;  %vm2617_vm7 = vcmask 1043459  }
  0xbb   : > { %v519_v30 = vpack.c.bf16 %v2804_v28, %v2803_v29 }
  0xbc   : > { %v388_v31 = vpop.permute.xlu1 %387  ;;  %v385_v32 = vpop.permute.xlu0 %384 }
  0xbd   : > { %vm436_vm8 = vcmp.eq.s32.totalorder %v3580_v38, %v388_v31  ;;  %vm435_vm9 = vcmp.eq.s32.totalorder %v3580_v38, %v385_v32  ;;  %3097 = vmatprep.mubr.msk.bf16.mxu0 %vm557_vm4, %v519_v30 }
  0xbe   : > { %v2806_v33 = vsel %vm436_vm8, 1.0, %v3479_v43  ;;  %v2805_v34 = vsel %vm435_vm9, 1.0, %v3479_v43  ;;  %vm2619_vm8 = vcmask 1044484   ;;  %vm2621_vm9 = vcmask 1045509  }
  0xbf   : > { %v520_v35 = vpack.c.bf16 %v2806_v33, %v2805_v34 }
  0xc0   : > { %v394_v36 = vpop.permute.xlu1 %393  ;;  %v391_v37 = vpop.permute.xlu0 %390 }
  0xc1   : > { %vm438_vm10 = vcmp.eq.s32.totalorder %v3580_v38, %v394_v36  ;;  %vm437_vm11 = vcmp.eq.s32.totalorder %v3580_v38, %v391_v37 }
  0xc2   : > { %v2808_v39 = vsel %vm438_vm10, 1.0, %v3479_v43  ;;  %v2807_v40 = vsel %vm437_vm11, 1.0, %v3479_v43  ;;  %3098 = vmatmul.mubr.msk.bf16.gmra.mrb[20].mxu0 %vm557_vm4, %v520_v35  ;;  %vm2623_vm10 = vcmask 1046534   ;;  %vm2625_vm11 = vcmask 1047559  }
  0xc3   : > { %v521_v41 = vpack.c.bf16 %v2808_v39, %v2807_v40 }
  0xc4   : > { %v400_v42 = vpop.permute.xlu1 %399  ;;  %v397_v44 = vpop.permute.xlu0 %396 }
  0xc5   : > { %vm440_vm12 = vcmp.eq.s32.totalorder %v3580_v38, %v400_v42  ;;  %vm439_vm13 = vcmp.eq.s32.totalorder %v3580_v38, %v397_v44  ;;  %3101 = vmatprep.mubr.msk.bf16.mxu0 %vm557_vm4, %v521_v41 }
  0xc6   : > { %v2810_v45 = vsel %vm440_vm12, 1.0, %v3479_v43  ;;  %v2809_v46 = vsel %vm439_vm13, 1.0, %v3479_v43  ;;  %vm2715_vm12 = vcmask 64512  }
  0xc7   : > { %v522_v47 = vpack.c.bf16 %v2810_v45, %v2809_v46 }
  0xc8   : > { %v406_v48 = vpop.permute.xlu1 %405  ;;  %v403_v49 = vpop.permute.xlu0 %402 }
  0xc9   : > { %vm442_vm14 = vcmp.eq.s32.totalorder %v3580_v38, %v406_v48  ;;  %vm441_vm15 = vcmp.eq.s32.totalorder %v3580_v38, %v403_v49 }
  0xca   : > { %v2812_v50 = vsel %vm442_vm14, 1.0, %v3479_v43  ;;  %v2811_v51 = vsel %vm441_vm15, 1.0, %v3479_v43  ;;  %3102 = vmatmul.mubr.msk.bf16.gmra.mrb[24].mxu0 %vm557_vm4, %v522_v47 }
  0xcb   : > { %v523_v52 = vpack.c.bf16 %v2812_v50, %v2811_v51 }
  0xcc   : > { %v412_v53 = vpop.permute.xlu1 %411  ;;  %v409_v54 = vpop.permute.xlu0 %408 }
  0xcd   : > { %vm444_vm0 = vcmp.eq.s32.totalorder %v3580_v38, %v412_v53  ;;  %vm443_vm1 = vcmp.eq.s32.totalorder %v3580_v38, %v409_v54  ;;  %3105 = vmatprep.mubr.msk.bf16.mxu0 %vm557_vm4, %v523_v52  ;;  %v3455_v38 = vld [vmem:[%s4123_s2 + $0x18] sm:$0xff]  }
  0xce   : > { %v2814_v55 = vsel %vm444_vm0, 1.0, %v3479_v43  ;;  %v2813_v56 = vsel %vm443_vm1, 1.0, %v3479_v43  ;;  %3111 = vmatprep.subr.bf16.mxu0 %v3455_v38 }
  0xcf   : > { %v524_v57 = vpack.c.bf16 %v2814_v55, %v2813_v56  ;;  %3112 = vmatpush3.bf16.msra.mxu0 %v3455_v38 }
  0xd0   : > { %3145 = vmatprep.subr.bf16.mxu0 %v3456_v59 }
  0xd2   : > { %3106 = vmatmul.mubr.msk.bf16.gmra.mrb[28].mxu0 %vm557_vm4, %v524_v57  ;;  %vm3480_vm4 = vmmov 0  }
 0x16d   : > { %v3079_v62 = vpop.f32.mrb[0].mxu0 }
 0x16e   : > { %770 = vst.msk [vmem:[#allocation2 + $0x10] sm:$0xff] %vm767_vm2, %v3079_v62  ;;  %v640_v63 = vpop.f32.mrb[1].mxu0 }
 0x16f   : > { %768 = vst.msk [vmem:[#allocation2] sm:$0xff] %vm767_vm2, %v640_v63  ;;  %v3080_v0 = vpop.f32.mrb[2].mxu0 }
 0x170   : > { %771 = vst.msk [vmem:[#allocation2 + $0x18] sm:$0xff] %vm767_vm2, %v3080_v0  ;;  %v643_v1 = vpop.f32.mrb[3].mxu0 }
 0x171   : > { %769 = vst.msk [vmem:[#allocation2 + $0x8] sm:$0xff] %vm767_vm2, %v643_v1 }
 0x175   : > { %v3083_v2 = vpop.f32.mrb[4].mxu0 }
 0x176   : > { %774 = vst.msk [vmem:[#allocation2 + $0x30] sm:$0xff] %vm767_vm2, %v3083_v2  ;;  %v656_v3 = vpop.f32.mrb[5].mxu0 }
 0x177   : > { %772 = vst.msk [vmem:[#allocation2 + $0x20] sm:$0xff] %vm767_vm2, %v656_v3  ;;  %v3084_v4 = vpop.f32.mrb[6].mxu0  ;;  %v855_v11 = vld [vmem:[#allocation2 + $0x11] sm:$0xff] }
 0x178   : > { %775 = vst.msk [vmem:[#allocation2 + $0x38] sm:$0xff] %vm767_vm2, %v3084_v4  ;;  %v659_v5 = vpop.f32.mrb[7].mxu0  ;;  %v853_v6 = vld [vmem:[#allocation2 + $0x1] sm:$0xff]  ;;  %v854_v7 = vld [vmem:[#allocation2 + $0x9] sm:$0xff] }
 0x179   : > { %773 = vst.msk [vmem:[#allocation2 + $0x28] sm:$0xff] %vm767_vm2, %v659_v5  ;;  %v885_v8 = vpack.c.bf16 %v854_v7, %v853_v6 }
 0x17b   : > { %3113 = vmatprep.mubr.msk.bf16.mxu0 %vm767_vm2, %v885_v8 }
 0x17d   : > { %v3087_v9 = vpop.f32.mrb[8].mxu0 }
 0x17e   : > { %778 = vst.msk [vmem:[#allocation2 + $0x50] sm:$0xff] %vm767_vm2, %v3087_v9  ;;  %v672_v10 = vpop.f32.mrb[9].mxu0  ;;  %v856_v12 = vld [vmem:[#allocation2 + $0x19] sm:$0xff]  ;;  %v1348_v9 = vld [vmem:[#allocation2 + $0x2] sm:$0xff] }
 0x17f   : > { %776 = vst.msk [vmem:[#allocation2 + $0x40] sm:$0xff] %vm767_vm2, %v672_v10  ;;  %v3088_v13 = vpop.f32.mrb[10].mxu0  ;;  %v886_v14 = vpack.c.bf16 %v856_v12, %v855_v11  ;;  %v859_v21 = vld [vmem:[#allocation2 + $0x31] sm:$0xff] }
 0x180   : > { %779 = vst.msk [vmem:[#allocation2 + $0x58] sm:$0xff] %vm767_vm2, %v3088_v13  ;;  %v675_v15 = vpop.f32.mrb[11].mxu0  ;;  %v857_v16 = vld [vmem:[#allocation2 + $0x21] sm:$0xff]  ;;  %v858_v17 = vld [vmem:[#allocation2 + $0x29] sm:$0xff] }
 0x181   : > { %777 = vst.msk [vmem:[#allocation2 + $0x48] sm:$0xff] %vm767_vm2, %v675_v15  ;;  %3114 = vmatmul.mubr.msk.bf16.vlgmr.msra.gmra.mrb[32].mxu0 %vm767_vm2, %v886_v14  ;;  %v887_v18 = vpack.c.bf16 %v858_v17, %v857_v16  ;;  %v1349_v13 = vld [vmem:[#allocation2 + $0xa] sm:$0xff] }
 0x182   : > { %3146 = vmatpush3.bf16.msra.mxu0 %v3456_v59 }
 0x183   : > { %3117 = vmatprep.mubr.msk.bf16.mxu0 %vm767_vm2, %v887_v18  ;;  %3147 = vmatprep.subr.bf16.mxu0 %v3457_v60 }
 0x185   : > { %v3091_v19 = vpop.f32.mrb[12].mxu0 }
 0x186   : > { %782 = vst.msk [vmem:[#allocation2 + $0x70] sm:$0xff] %vm767_vm2, %v3091_v19  ;;  %v688_v20 = vpop.f32.mrb[13].mxu0  ;;  %v860_v22 = vld [vmem:[#allocation2 + $0x39] sm:$0xff]  ;;  %3148 = vmatpush3.bf16.msra.mxu0 %v3457_v60 }
 0x187   : > { %780 = vst.msk [vmem:[#allocation2 + $0x60] sm:$0xff] %vm767_vm2, %v688_v20  ;;  %v3092_v23 = vpop.f32.mrb[14].mxu0  ;;  %v888_v24 = vpack.c.bf16 %v860_v22, %v859_v21  ;;  %3289 = vmatprep.subr.bf16.mxu0 %v3479_v43  ;;  %v863_v31 = vld [vmem:[#allocation2 + $0x51] sm:$0xff]  ;;  %v3459_v21 = vld [vmem:[%s4123_s2 + $0x28] sm:$0xff]   ;;  %v1380_v22 = vpack.c.bf16 %v1349_v13, %v1348_v9 }
 0x188   : > { %783 = vst.msk [vmem:[#allocation2 + $0x78] sm:$0xff] %vm767_vm2, %v3092_v23  ;;  %v691_v25 = vpop.f32.mrb[15].mxu0  ;;  %v861_v26 = vld [vmem:[#allocation2 + $0x41] sm:$0xff]  ;;  %v862_v27 = vld [vmem:[#allocation2 + $0x49] sm:$0xff] }
 0x189   : > { %781 = vst.msk [vmem:[#allocation2 + $0x68] sm:$0xff] %vm767_vm2, %v691_v25  ;;  %3118 = vmatmul.mubr.msk.bf16.gmra.mrb[36].mxu0 %vm767_vm2, %v888_v24  ;;  %v889_v28 = vpack.c.bf16 %v862_v27, %v861_v26  ;;  %v802_v25 = vld [vmem:[#allocation2 + $0x8] sm:$0xff]  ;;  %v3460_v26 = vld [vmem:[%s4123_s2 + $0x30] sm:$0xff]  }
 0x18b   : > { %3121 = vmatprep.mubr.msk.bf16.mxu0 %vm767_vm2, %v889_v28  ;;  %v801_v28 = vld [vmem:[#allocation2] sm:$0xff] }
 0x18d   : > { %v3095_v29 = vpop.f32.mrb[16].mxu0  ;;  %v815_v13 = vld [vmem:[#allocation2 + $0x70] sm:$0xff] }
 0x18e   : > { %786 = vst.msk [vmem:[#allocation2 + $0x90] sm:$0xff] %vm767_vm2, %v3095_v29  ;;  %v704_v30 = vpop.f32.mrb[17].mxu0  ;;  %v864_v32 = vld [vmem:[#allocation2 + $0x59] sm:$0xff] }
 0x18f   : > { %784 = vst.msk [vmem:[#allocation2 + $0x80] sm:$0xff] %vm767_vm2, %v704_v30  ;;  %v3096_v33 = vpop.f32.mrb[18].mxu0  ;;  %v890_v34 = vpack.c.bf16 %v864_v32, %v863_v31  ;;  %v867_v42 = vld [vmem:[#allocation2 + $0x71] sm:$0xff]  ;;  %v1351_v29 = vld [vmem:[#allocation2 + $0x1a] sm:$0xff]  ;;  %v833_v30 = vpack.c.bf16 %v802_v25, %v801_v28  ;;  %v1352_v31 = vld [vmem:[#allocation2 + $0x22] sm:$0xff] }
 0x190   : > { %787 = vst.msk [vmem:[#allocation2 + $0x98] sm:$0xff] %vm767_vm2, %v3096_v33  ;;  %v707_v35 = vpop.f32.mrb[19].mxu0  ;;  %v865_v36 = vld [vmem:[#allocation2 + $0x61] sm:$0xff]  ;;  %v866_v37 = vld [vmem:[#allocation2 + $0x69] sm:$0xff]  ;;  %v1350_v33 = vld [vmem:[#allocation2 + $0x12] sm:$0xff] }
 0x191   : > { %785 = vst.msk [vmem:[#allocation2 + $0x88] sm:$0xff] %vm767_vm2, %v707_v35  ;;  %3122 = vmatmul.mubr.msk.bf16.gmra.mrb[40].mxu0 %vm767_vm2, %v890_v34  ;;  %v891_v39 = vpack.c.bf16 %v866_v37, %v865_v36  ;;  %v1353_v32 = vld [vmem:[#allocation2 + $0x2a] sm:$0xff]  ;;  %v3461_v34 = vld [vmem:[%s4123_s2 + $0x38] sm:$0xff]  }
 0x192   : > { %v1382_v35 = vpack.c.bf16 %v1353_v32, %v1352_v31  ;;  %v804_v36 = vld [vmem:[#allocation2 + $0x18] sm:$0xff]  ;;  %v806_v37 = vld [vmem:[#allocation2 + $0x28] sm:$0xff] }
 0x193   : > { %3125 = vmatprep.mubr.msk.bf16.mxu0 %vm767_vm2, %v891_v39  ;;  %v803_v39 = vld [vmem:[#allocation2 + $0x10] sm:$0xff] }
 0x195   : > { %v3099_v40 = vpop.f32.mrb[20].mxu0  ;;  %v819_v25 = vld [vmem:[#allocation2 + $0x90] sm:$0xff] }
 0x196   : > { %790 = vst.msk [vmem:[#allocation2 + $0xb0] sm:$0xff] %vm767_vm2, %v3099_v40  ;;  %v720_v41 = vpop.f32.mrb[21].mxu0  ;;  %v868_v44 = vld [vmem:[#allocation2 + $0x79] sm:$0xff] }
 0x197   : > { %788 = vst.msk [vmem:[#allocation2 + $0xa0] sm:$0xff] %vm767_vm2, %v720_v41  ;;  %v3100_v45 = vpop.f32.mrb[22].mxu0  ;;  %v892_v46 = vpack.c.bf16 %v868_v44, %v867_v42  ;;  %v871_v53 = vld [vmem:[#allocation2 + $0x91] sm:$0xff]  ;;  %v3750_v40 = vld [vmem:[%s4123_s2 + $0x40] sm:$0xff]   ;;  %v834_v41 = vpack.c.bf16 %v804_v36, %v803_v39 }
 0x198   : > { %791 = vst.msk [vmem:[#allocation2 + $0xb8] sm:$0xff] %vm767_vm2, %v3100_v45  ;;  %v723_v47 = vpop.f32.mrb[23].mxu0  ;;  %v869_v48 = vld [vmem:[#allocation2 + $0x81] sm:$0xff]  ;;  %v870_v49 = vld [vmem:[#allocation2 + $0x89] sm:$0xff] }
 0x199   : > { %789 = vst.msk [vmem:[#allocation2 + $0xa8] sm:$0xff] %vm767_vm2, %v723_v47  ;;  %3126 = vmatmul.mubr.msk.bf16.gmra.mrb[44].mxu0 %vm767_vm2, %v892_v46  ;;  %v893_v50 = vpack.c.bf16 %v870_v49, %v869_v48  ;;  %v805_v42 = vld [vmem:[#allocation2 + $0x20] sm:$0xff]  ;;  %v1357_v47 = vld [vmem:[#allocation2 + $0x4a] sm:$0xff]  ;;  %v1354_v48 = vld [vmem:[#allocation2 + $0x32] sm:$0xff] }
 0x19a   : > { %v1355_v44 = vld [vmem:[#allocation2 + $0x3a] sm:$0xff]  ;;  %v835_v45 = vpack.c.bf16 %v806_v37, %v805_v42  ;;  %v1356_v46 = vld [vmem:[#allocation2 + $0x42] sm:$0xff] }
 0x19b   : > { %3129 = vmatprep.mubr.msk.bf16.mxu0 %vm767_vm2, %v893_v50  ;;  %v1383_v49 = vpack.c.bf16 %v1355_v44, %v1354_v48  ;;  %v1384_v50 = vpack.c.bf16 %v1357_v47, %v1356_v46 }
 0x19d   : > { %v3103_v51 = vpop.f32.mrb[24].mxu0  ;;  %v823_v36 = vld [vmem:[#allocation2 + $0xb0] sm:$0xff] }
 0x19e   : > { %794 = vst.msk [vmem:[#allocation2 + $0xd0] sm:$0xff] %vm767_vm2, %v3103_v51  ;;  %v736_v52 = vpop.f32.mrb[25].mxu0  ;;  %v872_v54 = vld [vmem:[#allocation2 + $0x99] sm:$0xff] }
 0x19f   : > { %792 = vst.msk [vmem:[#allocation2 + $0xc0] sm:$0xff] %vm767_vm2, %v736_v52  ;;  %v3104_v55 = vpop.f32.mrb[26].mxu0  ;;  %v894_v56 = vpack.c.bf16 %v872_v54, %v871_v53  ;;  %v875_v63 = vld [vmem:[#allocation2 + $0xb1] sm:$0xff]  ;;  %v810_v52 = vld [vmem:[#allocation2 + $0x48] sm:$0xff] }
 0x1a0   : > { %795 = vst.msk [vmem:[#allocation2 + $0xd8] sm:$0xff] %vm767_vm2, %v3104_v55  ;;  %v739_v57 = vpop.f32.mrb[27].mxu0  ;;  %v873_v58 = vld [vmem:[#allocation2 + $0xa1] sm:$0xff]  ;;  %v874_v38 = vld [vmem:[#allocation2 + $0xa9] sm:$0xff]  ;;  %v808_v51 = vld [vmem:[#allocation2 + $0x38] sm:$0xff] }
 0x1a1   : > { %793 = vst.msk [vmem:[#allocation2 + $0xc8] sm:$0xff] %vm767_vm2, %v739_v57  ;;  %3130 = vmatmul.mubr.msk.bf16.gmra.mrb[48].mxu0 %vm767_vm2, %v894_v56  ;;  %v895_v59 = vpack.c.bf16 %v874_v38, %v873_v58  ;;  %v807_v53 = vld [vmem:[#allocation2 + $0x30] sm:$0xff]  ;;  %v809_v55 = vld [vmem:[#allocation2 + $0x40] sm:$0xff] }
 0x1a2   : > { %v836_v54 = vpack.c.bf16 %v808_v51, %v807_v53  ;;  %v1359_v56 = vld [vmem:[#allocation2 + $0x5a] sm:$0xff]  ;;  %v837_v57 = vpack.c.bf16 %v810_v52, %v809_v55  ;;  %v1360_v58 = vld [vmem:[#allocation2 + $0x62] sm:$0xff]  ;;  %v1361_v38 = vld [vmem:[#allocation2 + $0x6a] sm:$0xff] }
 0x1a3   : > { %3133 = vmatprep.mubr.msk.bf16.mxu0 %vm767_vm2, %v895_v59  ;;  %v1358_v59 = vld [vmem:[#allocation2 + $0x52] sm:$0xff] }
 0x1a4   : > { %v1370_v32 = vld [vmem:[#allocation2 + $0xb2] sm:$0xff] }
 0x1a5   : > { %v3107_v60 = vpop.f32.mrb[28].mxu0  ;;  %v1655_v55 = vld [vmem:[#allocation2 + $0xb] sm:$0xff] }
 0x1a6   : > { %798 = vst.msk [vmem:[#allocation2 + $0xf0] sm:$0xff] %vm767_vm2, %v3107_v60  ;;  %v752_v62 = vpop.f32.mrb[29].mxu0  ;;  %v876_v0 = vld [vmem:[#allocation2 + $0xb9] sm:$0xff]  ;;  %v1385_v60 = vpack.c.bf16 %v1359_v56, %v1358_v59  ;;  %v1659_v59 = vld [vmem:[#allocation2 + $0x2b] sm:$0xff] }
 0x1a7   : > { %796 = vst.msk [vmem:[#allocation2 + $0xe0] sm:$0xff] %vm767_vm2, %v752_v62  ;;  %v3108_v1 = vpop.f32.mrb[30].mxu0  ;;  %v896_v2 = vpack.c.bf16 %v876_v0, %v875_v63  ;;  %v879_v7 = vld [vmem:[#allocation2 + $0xd1] sm:$0xff]  ;;  %v1386_v62 = vpack.c.bf16 %v1361_v38, %v1360_v58  ;;  %v814_v0 = vld [vmem:[#allocation2 + $0x68] sm:$0xff]  ;;  %v1371_v28 = vld [vmem:[#allocation2 + $0xba] sm:$0xff] }
 0x1a8   : > { %799 = vst.msk [vmem:[#allocation2 + $0xf8] sm:$0xff] %vm767_vm2, %v3108_v1  ;;  %v755_v3 = vpop.f32.mrb[31].mxu0  ;;  %v877_v4 = vld [vmem:[#allocation2 + $0xc1] sm:$0xff]  ;;  %v878_v5 = vld [vmem:[#allocation2 + $0xc9] sm:$0xff]  ;;  %v812_v63 = vld [vmem:[#allocation2 + $0x58] sm:$0xff] }
 0x1a9   : > { %797 = vst.msk [vmem:[#allocation2 + $0xe8] sm:$0xff] %vm767_vm2, %v755_v3  ;;  %3134 = vmatmul.mubr.msk.bf16.gmra.mrb[52].mxu0 %vm767_vm2, %v896_v2  ;;  %v897_v6 = vpack.c.bf16 %v878_v5, %v877_v4  ;;  %v811_v1 = vld [vmem:[#allocation2 + $0x50] sm:$0xff]  ;;  %v813_v3 = vld [vmem:[#allocation2 + $0x60] sm:$0xff] }
 0x1aa   : > { %v838_v2 = vpack.c.bf16 %v812_v63, %v811_v1  ;;  %v1363_v4 = vld [vmem:[#allocation2 + $0x7a] sm:$0xff]  ;;  %v839_v5 = vpack.c.bf16 %v814_v0, %v813_v3  ;;  %v1373_v31 = vld [vmem:[#allocation2 + $0xca] sm:$0xff]  ;;  %v1374_v46 = vld [vmem:[#allocation2 + $0xd2] sm:$0xff] }
 0x1ab   : > { %3137 = vmatprep.mubr.msk.bf16.mxu0 %vm767_vm2, %v897_v6  ;;  %v1364_v6 = vld [vmem:[#allocation2 + $0x82] sm:$0xff]  ;;  %v1663_v3 = vld [vmem:[#allocation2 + $0x4b] sm:$0xff] }
 0x1ac   : > { %v825_v39 = vld [vmem:[#allocation2 + $0xc0] sm:$0xff]  ;;  %v3463_v63 = vld [vmem:[%s4123_s2 + $0x48] sm:$0xff]  }
 0x1ad   : > { %v831_v19 = vld [vmem:[#allocation2 + $0xf0] sm:$0xff]  ;;  %v1657_v58 = vld [vmem:[#allocation2 + $0x1b] sm:$0xff]  ;;  %v1658_v38 = vld [vmem:[#allocation2 + $0x23] sm:$0xff] }
 0x1ae   : > { %v880_v8 = vld [vmem:[#allocation2 + $0xd9] sm:$0xff]  ;;  %v1688_v0 = vpack.c.bf16 %v1659_v59, %v1658_v38 }
 0x1af   : > { %v898_v10 = vpack.c.bf16 %v880_v8, %v879_v7  ;;  %v829_v11 = vld [vmem:[#allocation2 + $0xe0] sm:$0xff]  ;;  %v832_v12 = vld [vmem:[#allocation2 + $0xf8] sm:$0xff]  ;;  %v1365_v7 = vld [vmem:[#allocation2 + $0x8a] sm:$0xff] }
 0x1b0   : > { %v881_v14 = vld [vmem:[#allocation2 + $0xe1] sm:$0xff]  ;;  %v882_v15 = vld [vmem:[#allocation2 + $0xe9] sm:$0xff]  ;;  %v848_v20 = vpack.c.bf16 %v832_v12, %v831_v19  ;;  %v883_v23 = vld [vmem:[#allocation2 + $0xf1] sm:$0xff] }
 0x1b1   : > { %v830_v16 = vld [vmem:[#allocation2 + $0xe8] sm:$0xff]  ;;  %3138 = vmatmul.mubr.msk.bf16.gmra.mrb[56].mxu0 %vm767_vm2, %v898_v10  ;;  %v899_v17 = vpack.c.bf16 %v882_v15, %v881_v14  ;;  %v884_v24 = vld [vmem:[#allocation2 + $0xf9] sm:$0xff]  ;;  %v1388_v10 = vpack.c.bf16 %v1365_v7, %v1364_v6 }
 0x1b2   : > { %v847_v18 = vpack.c.bf16 %v830_v16, %v829_v11  ;;  %v900_v27 = vpack.c.bf16 %v884_v24, %v883_v23  ;;  %v1362_v8 = vld [vmem:[#allocation2 + $0x72] sm:$0xff]  ;;  %v818_v12 = vld [vmem:[#allocation2 + $0x88] sm:$0xff]  ;;  %v817_v15 = vld [vmem:[#allocation2 + $0x80] sm:$0xff] }
 0x1b3   : > { %3141 = vmatprep.mubr.msk.bf16.mxu0 %vm767_vm2, %v899_v17  ;;  %v1387_v9 = vpack.c.bf16 %v1363_v4, %v1362_v8  ;;  %v816_v11 = vld [vmem:[#allocation2 + $0x78] sm:$0xff]  ;;  %v841_v17 = vpack.c.bf16 %v818_v12, %v817_v15  ;;  %v1369_v19 = vld [vmem:[#allocation2 + $0xaa] sm:$0xff]  ;;  %v1376_v44 = vld [vmem:[#allocation2 + $0xe2] sm:$0xff] }
 0x1b4   : > { %3177 = vmatprep.mubr.msk.bf16.mxu1 %vm767_vm2, %v847_v18  ;;  %v840_v14 = vpack.c.bf16 %v816_v11, %v815_v13  ;;  %v1367_v16 = vld [vmem:[#allocation2 + $0x9a] sm:$0xff]  ;;  %v1368_v18 = vld [vmem:[#allocation2 + $0xa2] sm:$0xff]  ;;  %v1378_v52 = vld [vmem:[#allocation2 + $0xf2] sm:$0xff] }
 0x1b5   : > { %3178 = vmatmul.mubr.msk.bf16.vlgmr.msra.gmra.mrb[0].mxu1 %vm767_vm2, %v848_v20  ;;  %v1366_v20 = vld [vmem:[#allocation2 + $0x92] sm:$0xff]  ;;  %v822_v24 = vld [vmem:[#allocation2 + $0xa8] sm:$0xff]  ;;  %v1379_v53 = vld [vmem:[#allocation2 + $0xfa] sm:$0xff] }
 0x1b6   : > { %3182 = vmatpush3.bf16.msra.mxu1 %v3679_v61  ;;  %3185 = vmatprep.mubr.msk.bf16.mxu1 %vm767_vm2, %v1380_v22  ;;  %v1381_v61 = vpack.c.bf16 %v1351_v29, %v1350_v33  ;;  %v1390_v22 = vpack.c.bf16 %v1369_v19, %v1368_v18  ;;  %v820_v23 = vld [vmem:[#allocation2 + $0x98] sm:$0xff]  ;;  %v1391_v33 = vpack.c.bf16 %v1371_v28, %v1370_v32  ;;  %v1666_v8 = vld [vmem:[#allocation2 + $0x63] sm:$0xff]  ;;  %v1683_v32 = vld [vmem:[#allocation2 + $0xeb] sm:$0xff] }
 0x1b7   : > { %3183 = vmatprep.subr.bf16.mxu1 %v3459_v21  ;;  %v1395_v56 = vpack.c.bf16 %v1379_v53, %v1378_v52  ;;  %v1661_v1 = vld [vmem:[#allocation2 + $0x3b] sm:$0xff]  ;;  %v1660_v4 = vld [vmem:[#allocation2 + $0x33] sm:$0xff]  ;;  %v1670_v13 = vld [vmem:[#allocation2 + $0x83] sm:$0xff] }
 0x1b8   : > { %v1665_v7 = vld [vmem:[#allocation2 + $0x5b] sm:$0xff]  ;;  %v1668_v15 = vld [vmem:[#allocation2 + $0x73] sm:$0xff]  ;;  %v1674_v19 = vld [vmem:[#allocation2 + $0xa3] sm:$0xff] }
 0x1b9   : > { %3142 = vmatmul.mubr.msk.bf16.gmra.mrb[60].mxu0 %vm767_vm2, %v900_v27  ;;  %v821_v27 = vld [vmem:[#allocation2 + $0xa0] sm:$0xff]  ;;  %v1969_v52 = vld [vmem:[#allocation2 + $0x4c] sm:$0xff]  ;;  %v1966_v53 = vld [vmem:[#allocation2 + $0x34] sm:$0xff] }
 0x1ba   : > { %3184 = vmatpush3.bf16.msra.mxu1 %v3459_v21  ;;  %3149 = vmatprep.mubr.msk.bf16.mxu0 %vm767_vm2, %v833_v30  ;;  %v1389_v21 = vpack.c.bf16 %v1367_v16, %v1366_v20  ;;  %v843_v29 = vpack.c.bf16 %v822_v24, %v821_v27  ;;  %v1372_v30 = vld [vmem:[#allocation2 + $0xc2] sm:$0xff]  ;;  %v1675_v20 = vld [vmem:[#allocation2 + $0xab] sm:$0xff]  ;;  %v1676_v27 = vld [vmem:[#allocation2 + $0xb3] sm:$0xff] }
 0x1bb   : > { %3217 = vmatprep.subr.bf16.mxu1 %v3460_v26  ;;  %v1669_v12 = vld [vmem:[#allocation2 + $0x7b] sm:$0xff] }
 0x1bc   : > { %v1693_v16 = vpack.c.bf16 %v1669_v12, %v1668_v15  ;;  %v1673_v18 = vld [vmem:[#allocation2 + $0x9b] sm:$0xff] }
 0x1bd   : > { %3186 = vmatmul.mubr.msk.bf16.vlgmr.msra.gmra.mrb[4].mxu1 %vm767_vm2, %v1381_v61  ;;  %v1392_v61 = vpack.c.bf16 %v1373_v31, %v1372_v30  ;;  %v1677_v24 = vld [vmem:[#allocation2 + $0xbb] sm:$0xff]  ;;  %v1682_v31 = vld [vmem:[#allocation2 + $0xe3] sm:$0xff] }
 0x1be   : > { %3218 = vmatpush3.bf16.msra.mxu1 %v3460_v26  ;;  %3189 = vmatprep.mubr.msk.bf16.mxu1 %vm767_vm2, %v1382_v35  ;;  %v842_v26 = vpack.c.bf16 %v820_v23, %v819_v25  ;;  %v826_v35 = vld [vmem:[#allocation2 + $0xc8] sm:$0xff]  ;;  %v1696_v23 = vpack.c.bf16 %v1675_v20, %v1674_v19  ;;  %v1697_v28 = vpack.c.bf16 %v1677_v24, %v1676_v27  ;;  %v1681_v30 = vld [vmem:[#allocation2 + $0xdb] sm:$0xff] }
 0x1bf   : > { %3219 = vmatprep.subr.bf16.mxu1 %v3461_v34  ;;  %v845_v42 = vpack.c.bf16 %v826_v35, %v825_v39  ;;  %v1678_v25 = vld [vmem:[#allocation2 + $0xc3] sm:$0xff]  ;;  %v1684_v35 = vld [vmem:[#allocation2 + $0xf3] sm:$0xff] }
 0x1c0   : > { %v1961_v39 = vld [vmem:[#allocation2 + $0xc] sm:$0xff]  ;;  %v1970_v38 = vld [vmem:[#allocation2 + $0x54] sm:$0xff]  ;;  %v1987_v15 = vld [vmem:[#allocation2 + $0xdc] sm:$0xff] }
 0x1c1   : > { %3150 = vmatmul.mubr.msk.bf16.vlgmr.msra.gmra.mrb[32].mxu0 %vm767_vm2, %v834_v41  ;;  %v1375_v41 = vld [vmem:[#allocation2 + $0xda] sm:$0xff] }
 0x1c2   : > { %3220 = vmatpush3.bf16.msra.mxu1 %v3461_v34  ;;  %3153 = vmatprep.mubr.msk.bf16.mxu0 %vm767_vm2, %v835_v45  ;;  %v824_v34 = vld [vmem:[#allocation2 + $0xb8] sm:$0xff]  ;;  %v1377_v45 = vld [vmem:[#allocation2 + $0xea] sm:$0xff]  ;;  %v1393_v47 = vpack.c.bf16 %v1375_v41, %v1374_v46 }
 0x1c3   : > { %3253 = vmatprep.subr.bf16.mxu1 %v3750_v40  ;;  %v844_v37 = vpack.c.bf16 %v824_v34, %v823_v36  ;;  %v1394_v48 = vpack.c.bf16 %v1377_v45, %v1376_v44  ;;  %v1700_v34 = vpack.c.bf16 %v1683_v32, %v1682_v31  ;;  %v1685_v36 = vld [vmem:[#allocation2 + $0xfb] sm:$0xff]  ;;  %v1964_v45 = vld [vmem:[#allocation2 + $0x24] sm:$0xff]  ;;  %v1965_v46 = vld [vmem:[#allocation2 + $0x2c] sm:$0xff] }
 0x1c4   : > { %v1701_v41 = vpack.c.bf16 %v1685_v36, %v1684_v35  ;;  %v1963_v44 = vld [vmem:[#allocation2 + $0x1c] sm:$0xff]  ;;  %v1982_v12 = vld [vmem:[#allocation2 + $0xb4] sm:$0xff] }
 0x1c5   : > { %3190 = vmatmul.mubr.msk.bf16.gmra.mrb[8].mxu1 %vm767_vm2, %v1383_v49  ;;  %v828_v49 = vld [vmem:[#allocation2 + $0xd8] sm:$0xff] }
 0x1c6   : > { %3193 = vmatprep.mubr.msk.bf16.mxu1 %vm767_vm2, %v1384_v50  ;;  %v827_v50 = vld [vmem:[#allocation2 + $0xd0] sm:$0xff] }
 0x1c7   : > { %v846_v51 = vpack.c.bf16 %v828_v49, %v827_v50  ;;  %v1994_v49 = vpack.c.bf16 %v1965_v46, %v1964_v45  ;;  %v1967_v50 = vld [vmem:[#allocation2 + $0x3c] sm:$0xff] }
 0x1c9   : > { %3154 = vmatmul.mubr.msk.bf16.gmra.mrb[36].mxu0 %vm767_vm2, %v836_v54  ;;  %v1654_v54 = vld [vmem:[#allocation2 + $0x3] sm:$0xff] }
 0x1ca   : > { %3157 = vmatprep.mubr.msk.bf16.mxu0 %vm767_vm2, %v837_v57  ;;  %v1686_v57 = vpack.c.bf16 %v1655_v55, %v1654_v54  ;;  %v1995_v54 = vpack.c.bf16 %v1967_v50, %v1966_v53 }
 0x1cd   : > { %3194 = vmatmul.mubr.msk.bf16.gmra.mrb[12].mxu1 %vm767_vm2, %v1385_v60  ;;  %v1656_v60 = vld [vmem:[#allocation2 + $0x13] sm:$0xff] }
 0x1ce   : > { %3197 = vmatprep.mubr.msk.bf16.mxu1 %vm767_vm2, %v1386_v62  ;;  %v1687_v62 = vpack.c.bf16 %v1657_v58, %v1656_v60  ;;  %v1973_v58 = vld [vmem:[#allocation2 + $0x6c] sm:$0xff] }
 0x1d1   : > { %3158 = vmatmul.mubr.msk.bf16.gmra.mrb[40].mxu0 %vm767_vm2, %v838_v2  ;;  %v1662_v2 = vld [vmem:[#allocation2 + $0x43] sm:$0xff] }
 0x1d2   : > { %3161 = vmatprep.mubr.msk.bf16.mxu0 %vm767_vm2, %v839_v5  ;;  %v1689_v5 = vpack.c.bf16 %v1661_v1, %v1660_v4  ;;  %v1690_v6 = vpack.c.bf16 %v1663_v3, %v1662_v2  ;;  %v1974_v1 = vld [vmem:[#allocation2 + $0x74] sm:$0xff]  ;;  %v1979_v4 = vld [vmem:[#allocation2 + $0x9c] sm:$0xff] }
 0x1d5   : > { %3198 = vmatmul.mubr.msk.bf16.gmra.mrb[16].mxu1 %vm767_vm2, %v1387_v9  ;;  %v1667_v9 = vld [vmem:[#allocation2 + $0x6b] sm:$0xff] }
 0x1d6   : > { %3201 = vmatprep.mubr.msk.bf16.mxu1 %vm767_vm2, %v1388_v10  ;;  %v1664_v10 = vld [vmem:[#allocation2 + $0x53] sm:$0xff] }
 0x1d7   : > { %v1691_v11 = vpack.c.bf16 %v1665_v7, %v1664_v10  ;;  %v1978_v7 = vld [vmem:[#allocation2 + $0x94] sm:$0xff]  ;;  %v1983_v10 = vld [vmem:[#allocation2 + $0xbc] sm:$0xff] }
 0x1d9   : > { %3162 = vmatmul.mubr.msk.bf16.gmra.mrb[44].mxu0 %vm767_vm2, %v840_v14  ;;  %v1671_v14 = vld [vmem:[#allocation2 + $0x8b] sm:$0xff] }
 0x1da   : > { %3165 = vmatprep.mubr.msk.bf16.mxu0 %vm767_vm2, %v841_v17  ;;  %v1694_v17 = vpack.c.bf16 %v1671_v14, %v1670_v13  ;;  %v2003_v13 = vpack.c.bf16 %v1983_v10, %v1982_v12 }
 0x1dd   : > { %3202 = vmatmul.mubr.msk.bf16.gmra.mrb[20].mxu1 %vm767_vm2, %v1389_v21  ;;  %v1672_v21 = vld [vmem:[#allocation2 + $0x93] sm:$0xff] }
 0x1de   : > { %3205 = vmatprep.mubr.msk.bf16.mxu1 %vm767_vm2, %v1390_v22  ;;  %v1695_v22 = vpack.c.bf16 %v1673_v18, %v1672_v21  ;;  %v1986_v18 = vld [vmem:[#allocation2 + $0xd4] sm:$0xff] }
 0x1df   : > { %v2005_v19 = vpack.c.bf16 %v1987_v15, %v1986_v18  ;;  %v1990_v21 = vld [vmem:[#allocation2 + $0xf4] sm:$0xff]  ;;  %v2338_v18 = vld [vmem:[%s4127_s6 + $0x8] sm:$0xff] }
 0x1e1   : > { %3166 = vmatmul.mubr.msk.bf16.gmra.mrb[48].mxu0 %vm767_vm2, %v842_v26  ;;  %v1679_v26 = vld [vmem:[#allocation2 + $0xcb] sm:$0xff] }
 0x1e2   : > { %3169 = vmatprep.mubr.msk.bf16.mxu0 %vm767_vm2, %v843_v29  ;;  %v1698_v29 = vpack.c.bf16 %v1679_v26, %v1678_v25 }
 0x1e5   : > { %3206 = vmatmul.mubr.msk.bf16.gmra.mrb[24].mxu1 %vm767_vm2, %v1391_v33  ;;  %v1680_v33 = vld [vmem:[#allocation2 + $0xd3] sm:$0xff] }
 0x1e6   : > { %3209 = vmatprep.mubr.msk.bf16.mxu1 %vm767_vm2, %v1392_v61  ;;  %v1699_v61 = vpack.c.bf16 %v1681_v30, %v1680_v33 }
 0x1e9   : > { %3170 = vmatmul.mubr.msk.bf16.gmra.mrb[52].mxu0 %vm767_vm2, %v844_v37  ;;  %v1960_v37 = vld [vmem:[#allocation2 + $0x4] sm:$0xff] }
 0x1ea   : > { %3173 = vmatprep.mubr.msk.bf16.mxu0 %vm767_vm2, %v845_v42  ;;  %v1992_v42 = vpack.c.bf16 %v1961_v39, %v1960_v37 }
 0x1ed   : > { %3210 = vmatmul.mubr.msk.bf16.gmra.mrb[28].mxu1 %vm767_vm2, %v1393_v47  ;;  %v1962_v47 = vld [vmem:[#allocation2 + $0x14] sm:$0xff] }
 0x1ee   : > { %3213 = vmatprep.mubr.msk.bf16.mxu1 %vm767_vm2, %v1394_v48  ;;  %v1993_v48 = vpack.c.bf16 %v1963_v44, %v1962_v47 }
 0x1f1   : > { %3174 = vmatmul.mubr.msk.bf16.gmra.mrb[56].mxu0 %vm767_vm2, %v846_v51  ;;  %v1968_v51 = vld [vmem:[#allocation2 + $0x44] sm:$0xff] }
 0x1f2   : > { %v1996_v55 = vpack.c.bf16 %v1969_v52, %v1968_v51  ;;  %3301 = vmatprep.mubr.msk.bf16.mxu0 %vm3480_vm4, %v3479_v43 }
 0x1f5   : > { %3214 = vmatmul.mubr.msk.bf16.gmra.mrb[0].mxu1 %vm767_vm2, %v1395_v56  ;;  %v1971_v56 = vld [vmem:[#allocation2 + $0x5c] sm:$0xff] }
 0x1f6   : > { %3221 = vmatprep.mubr.msk.bf16.mxu1 %vm767_vm2, %v1686_v57  ;;  %v1972_v57 = vld [vmem:[#allocation2 + $0x64] sm:$0xff]  ;;  %v1997_v59 = vpack.c.bf16 %v1971_v56, %v1970_v38 }
 0x1f7   : > { %v1998_v60 = vpack.c.bf16 %v1973_v58, %v1972_v57  ;;  %v3464_v58 = vld [vmem:[%s4125_s4] sm:$0xff]   ;;  %v3465_v38 = vld [vmem:[%s4125_s4 + $0x8] sm:$0xff]  }
 0x1f8   : > { %3290 = vmatpush3.bf16.msra.mxu0 %v3464_v58 }
 0x1f9   : > { %3291 = vmatprep.subr.bf16.mxu0 %v3479_v43 }
 0x1fc   : > { %3292 = vmatpush3.bf16.msra.mxu0 %v3465_v38 }
 0x1fd   : > { %3222 = vmatmul.mubr.msk.bf16.vlgmr.msra.gmra.mrb[4].mxu1 %vm767_vm2, %v1687_v62  ;;  %v1975_v62 = vld [vmem:[#allocation2 + $0x7c] sm:$0xff]  ;;  %3293 = vmatprep.subr.bf16.mxu0 %v3479_v43 }
 0x1fe   : > { %3254 = vmatpush3.bf16.msra.mxu1 %v3750_v40  ;;  %3225 = vmatprep.mubr.msk.bf16.mxu1 %vm767_vm2, %v1688_v0  ;;  %v1692_v40 = vpack.c.bf16 %v1667_v9, %v1666_v8  ;;  %v1977_v0 = vld [vmem:[#allocation2 + $0x8c] sm:$0xff]  ;;  %v1999_v2 = vpack.c.bf16 %v1975_v62, %v1974_v1  ;;  %v2001_v8 = vpack.c.bf16 %v1979_v4, %v1978_v7  ;;  %v3468_v62 = vld [vmem:[%s4125_s4 + $0x20] sm:$0xff]  }
 0x1ff   : > { %3255 = vmatprep.subr.bf16.mxu1 %v3463_v63  ;;  %v3898_v1 = vld [vmem:[%s4124_s3] ss:$0 sm:$0xff] }
 0x202   : > { %3256 = vmatpush3.bf16.msra.mxu1 %v3463_v63  ;;  %v1976_v63 = vld [vmem:[#allocation2 + $0x84] sm:$0xff] }
 0x203   : > { %v2000_v3 = vpack.c.bf16 %v1977_v0, %v1976_v63  ;;  %v3469_v63 = vld [vmem:[%s4125_s4 + $0x28] sm:$0xff]  }
 0x205   : > { %3226 = vmatmul.mubr.msk.bf16.gmra.mrb[8].mxu1 %vm767_vm2, %v1689_v5  ;;  %v1980_v5 = vld [vmem:[#allocation2 + $0xa4] sm:$0xff] }
 0x206   : > { %3229 = vmatprep.mubr.msk.bf16.mxu1 %vm767_vm2, %v1690_v6  ;;  %v1981_v6 = vld [vmem:[#allocation2 + $0xac] sm:$0xff] }
 0x207   : > { %v2002_v9 = vpack.c.bf16 %v1981_v6, %v1980_v5 }
 0x20d   : > { %3230 = vmatmul.mubr.msk.bf16.gmra.mrb[12].mxu1 %vm767_vm2, %v1691_v11  ;;  %v1984_v11 = vld [vmem:[#allocation2 + $0xc4] sm:$0xff] }
 0x20e   : > { %3233 = vmatprep.mubr.msk.bf16.mxu1 %vm767_vm2, %v1692_v40  ;;  %v1985_v40 = vld [vmem:[#allocation2 + $0xcc] sm:$0xff] }
 0x20f   : > { %v2004_v14 = vpack.c.bf16 %v1985_v40, %v1984_v11  ;;  %v2337_v40 = vld [vmem:[%s4127_s6] sm:$0xff] }
 0x215   : > { %3234 = vmatmul.mubr.msk.bf16.gmra.mrb[16].mxu1 %vm767_vm2, %v1693_v16  ;;  %v1988_v16 = vld [vmem:[#allocation2 + $0xe4] sm:$0xff] }
 0x216   : > { %3237 = vmatprep.mubr.msk.bf16.mxu1 %vm767_vm2, %v1694_v17  ;;  %v1989_v17 = vld [vmem:[#allocation2 + $0xec] sm:$0xff] }
 0x217   : > { %v2006_v20 = vpack.c.bf16 %v1989_v17, %v1988_v16 }
 0x21d   : > { %3238 = vmatmul.mubr.msk.bf16.gmra.mrb[20].mxu1 %vm767_vm2, %v1695_v22  ;;  %v1991_v22 = vld [vmem:[#allocation2 + $0xfc] sm:$0xff] }
 0x21e   : > { %3241 = vmatprep.mubr.msk.bf16.mxu1 %vm767_vm2, %v1696_v23  ;;  %v2007_v23 = vpack.c.bf16 %v1991_v22, %v1990_v21 }
 0x225   : > { %3242 = vmatmul.mubr.msk.bf16.gmra.mrb[24].mxu1 %vm767_vm2, %v1697_v28 }
 0x226   : > { %3245 = vmatprep.mubr.msk.bf16.mxu1 %vm767_vm2, %v1698_v29 }
 0x22d   : > { %3246 = vmatmul.mubr.msk.bf16.gmra.mrb[28].mxu1 %vm767_vm2, %v1699_v61 }
 0x22e   : > { %3249 = vmatprep.mubr.msk.bf16.mxu1 %vm767_vm2, %v1700_v34 }
 0x235   : > { %3250 = vmatmul.mubr.msk.bf16.gmra.mrb[0].mxu1 %vm767_vm2, %v1701_v41 }
 0x236   : > { %3257 = vmatprep.mubr.msk.bf16.mxu1 %vm767_vm2, %v1992_v42 }
 0x23d   : > { %3258 = vmatmul.mubr.msk.bf16.vlgmr.msra.gmra.mrb[4].mxu1 %vm767_vm2, %v1993_v48 }
 0x23e   : > { %3261 = vmatprep.mubr.msk.bf16.mxu1 %vm767_vm2, %v1994_v49 }
 0x245   : > { %3262 = vmatmul.mubr.msk.bf16.gmra.mrb[8].mxu1 %vm767_vm2, %v1995_v54 }
 0x246   : > { %3265 = vmatprep.mubr.msk.bf16.mxu1 %vm767_vm2, %v1996_v55 }
 0x24d   : > { %3266 = vmatmul.mubr.msk.bf16.gmra.mrb[12].mxu1 %vm767_vm2, %v1997_v59  ;;  %v3466_v59 = vld [vmem:[%s4125_s4 + $0x10] sm:$0xff]  }
 0x24e   : > { %3269 = vmatprep.mubr.msk.bf16.mxu1 %vm767_vm2, %v1998_v60  ;;  %3294 = vmatpush3.bf16.msra.mxu0 %v3466_v59  ;;  %v3467_v60 = vld [vmem:[%s4125_s4 + $0x18] sm:$0xff]  }
 0x24f   : > { %3295 = vmatprep.subr.bf16.mxu0 %v3479_v43 }
 0x252   : > { %3296 = vmatpush3.bf16.msra.mxu0 %v3467_v60 }
 0x253   : > { %3297 = vmatprep.subr.bf16.mxu0 %v3479_v43 }
 0x255   : > { %3270 = vmatmul.mubr.msk.bf16.gmra.mrb[16].mxu1 %vm767_vm2, %v1999_v2 }
 0x256   : > { %3273 = vmatprep.mubr.msk.bf16.mxu1 %vm767_vm2, %v2000_v3  ;;  %3298 = vmatpush3.bf16.msra.mxu0 %v3468_v62 }
 0x257   : > { %3299 = vmatprep.subr.bf16.mxu0 %v3479_v43 }
 0x25a   : > { %3300 = vmatpush3.bf16.msra.mxu0 %v3469_v63 }
 0x25d   : > { %3274 = vmatmul.mubr.msk.bf16.gmra.mrb[20].mxu1 %vm767_vm2, %v2001_v8 }
 0x25e   : > { %3277 = vmatprep.mubr.msk.bf16.mxu1 %vm767_vm2, %v2002_v9  ;;  %v2339_v9 = vld [vmem:[%s4127_s6 + $0x10] sm:$0xff] }
 0x265   : > { %3278 = vmatmul.mubr.msk.bf16.gmra.mrb[24].mxu1 %vm767_vm2, %v2003_v13 }
 0x266   : > { %3281 = vmatprep.mubr.msk.bf16.mxu1 %vm767_vm2, %v2004_v14  ;;  %v2340_v14 = vld [vmem:[%s4127_s6 + $0x18] sm:$0xff] }
 0x26d   : > { %3282 = vmatmul.mubr.msk.bf16.gmra.mrb[28].mxu1 %vm767_vm2, %v2005_v19 }
 0x26e   : > { %3285 = vmatprep.mubr.msk.bf16.mxu1 %vm767_vm2, %v2006_v20 }
 0x275   : > { %3286 = vmatmul.mubr.msk.bf16.gmra.mrb[0].mxu1 %vm767_vm2, %v2007_v23 }
 0x28c   : > { %v3815_v24 = vpop.f32.mrb[60].mxu0 }
 0x28d   : > { %v3817_v25 = vpop.f32.mrb[61].mxu0 }
 0x28e   : > { %v3819_v26 = vpop.f32.mrb[62].mxu0 }
 0x28f   : > { %v3821_v27 = vpop.f32.mrb[63].mxu0 }
 0x294   : > { %v3151_v28 = vpop.f32.mrb[32].mxu0 }
 0x295   : > { %v1221_v29 = vpop.f32.mrb[33].mxu0 }
 0x296   : > { %v3152_v30 = vpop.f32.mrb[34].mxu0 }
 0x297   : > { %v1224_v31 = vpop.f32.mrb[35].mxu0 }
 0x29c   : > { %v3823_v32 = vpop.f32.mrb[36].mxu0 }
 0x29d   : > { %v3825_v33 = vpop.f32.mrb[37].mxu0 }
 0x29e   : > { %v3827_v61 = vpop.f32.mrb[38].mxu0 }
 0x29f   : > { %v3829_v34 = vpop.f32.mrb[39].mxu0 }
 0x2a4   : > { %v3831_v35 = vpop.f32.mrb[40].mxu0 }
 0x2a5   : > { %v3833_v36 = vpop.f32.mrb[41].mxu0 }
 0x2a6   : > { %v3835_v37 = vpop.f32.mrb[42].mxu0 }
 0x2a7   : > { %v3837_v39 = vpop.f32.mrb[43].mxu0 }
 0x2ac   : > { %v3839_v41 = vpop.f32.mrb[44].mxu0 }
 0x2ad   : > { %v3841_v42 = vpop.f32.mrb[45].mxu0 }
 0x2ae   : > { %v3843_v44 = vpop.f32.mrb[46].mxu0 }
 0x2af   : > { %v3845_v45 = vpop.f32.mrb[47].mxu0 }
 0x2b4   : > { %v3847_v46 = vpop.f32.mrb[48].mxu0 }
 0x2b5   : > { %v3849_v47 = vpop.f32.mrb[49].mxu0 }
 0x2b6   : > { %v3851_v48 = vpop.f32.mrb[50].mxu0 }
 0x2b7   : > { %v3853_v49 = vpop.f32.mrb[51].mxu0 }
 0x2bc   : > { %v3855_v50 = vpop.f32.mrb[52].mxu0 }
 0x2bd   : > { %v3857_v51 = vpop.f32.mrb[53].mxu0 }
 0x2be   : > { %v3859_v52 = vpop.f32.mrb[54].mxu0 }
 0x2bf   : > { %v3861_v53 = vpop.f32.mrb[55].mxu0 }
 0x2c4   : > { %v3863_v54 = vpop.f32.mrb[56].mxu0 }
 0x2c5   : > { %v3865_v55 = vpop.f32.mrb[57].mxu0 }
 0x2c6   : > { %v3867_v56 = vpop.f32.mrb[58].mxu0 }
 0x2c7   : > { %v3869_v57 = vpop.f32.mrb[59].mxu0 }
 0x310   : > { %v3259_v0 = vpop.f32.mrb[4].mxu1 }
 0x311   : > { %v3309_v2 = vadd.f32 %v3259_v0, %v3151_v28  ;;  %v2107_v3 = vpop.f32.mrb[5].mxu1 }
 0x312   : > { %v3310_v4 = vadd.f32 %v2107_v3, %v1221_v29  ;;  %v3260_v5 = vpop.f32.mrb[6].mxu1 }
 0x313   : > { %v2275_v6 = vadd.f32 %v3309_v2, %v3898_v1  ;;  %v3311_v7 = vadd.f32 %v3260_v5, %v3152_v30  ;;  %v2110_v8 = vpop.f32.mrb[7].mxu1 }
 0x314   : > { %v2273_v43 = vadd.f32 %v3310_v4, %v3898_v1  ;;  %v3312_v10 = vadd.f32 %v2110_v8, %v1224_v31 }
 0x315   : > { %v2307_v11 = vmax.f32 %v2275_v6, 0.0  ;;  %v2276_v12 = vadd.f32 %v3311_v7, %v3898_v1  ;;  %v2341_v6 = vld [vmem:[%s4127_s6 + $0x20] sm:$0xff] }
 0x316   : > { %v2305_v13 = vmax.f32 %v2273_v43, 0.0  ;;  %v2274_v15 = vadd.f32 %v3312_v10, %v3898_v1 }
 0x317   : > { %v2371_v16 = vmul.f32 %v2339_v9, %v2307_v11  ;;  %v2308_v17 = vmax.f32 %v2276_v12, 0.0  ;;  %v2344_v9 = vld [vmem:[%s4127_s6 + $0x38] sm:$0xff] }
 0x318   : > { %v2369_v19 = vmul.f32 %v2337_v40, %v2305_v13  ;;  %v2306_v20 = vmax.f32 %v2274_v15, 0.0  ;;  %v3263_v21 = vpop.f32.mrb[8].mxu1 }
 0x319   : > { %v2372_v22 = vmul.f32 %v2340_v14, %v2308_v17  ;;  %v3313_v23 = vadd.f32 %v3263_v21, %v3823_v32  ;;  %v2123_v28 = vpop.f32.mrb[9].mxu1  ;;  %v2411_v29 = vsel %vm2401_vm3, %v2371_v16, -inf  ;;  %v2343_v32 = vld [vmem:[%s4127_s6 + $0x30] sm:$0xff] }
 0x31a   : > { %v2370_v30 = vmul.f32 %v2338_v18, %v2306_v20  ;;  %v3314_v31 = vadd.f32 %v2123_v28, %v3825_v33  ;;  %v3264_v58 = vpop.f32.mrb[10].mxu1  ;;  %v2402_v38 = vsel %vm2401_vm3, %v2369_v19, -inf }
 0x31b   : > { %v2412_v59 = vsel %vm2401_vm3, %v2372_v22, -inf  ;;  %v2279_v60 = vadd.f32 %v3313_v23, %v3898_v1  ;;  %v3315_v62 = vadd.f32 %v3264_v58, %v3827_v61  ;;  %v2126_v63 = vpop.f32.mrb[11].mxu1 }
 0x31c   : > { %v2413_v0 = vmax.f32 %v2411_v29, %v2412_v59  ;;  %v2403_v2 = vsel %vm2401_vm3, %v2370_v30, -inf  ;;  %v2277_v3 = vadd.f32 %v3314_v31, %v3898_v1  ;;  %v3316_v33 = vadd.f32 %v2126_v63, %v3829_v34  ;;  %v2342_v34 = vld [vmem:[%s4127_s6 + $0x28] sm:$0xff]  ;;  %v2347_v63 = vld [vmem:[%s4127_s6 + $0x50] sm:$0xff] }
 0x31d   : > { %v2404_v4 = vmax.f32 %v2402_v38, %v2403_v2  ;;  %v2311_v5 = vmax.f32 %v2279_v60, 0.0  ;;  %v2280_v61 = vadd.f32 %v3315_v62, %v3898_v1 }
 0x31e   : > { %v2414_v7 = vrot.slane %v2413_v0, 4  ;;  %v2309_v8 = vmax.f32 %v2277_v3, 0.0  ;;  %v2278_v43 = vadd.f32 %v3316_v33, %v3898_v1  ;;  %v2345_v3 = vld [vmem:[%s4127_s6 + $0x40] sm:$0xff] }
 0x31f   : > { %v2405_v10 = vrot.slane %v2404_v4, 4  ;;  %v2375_v11 = vmul.f32 %v2343_v32, %v2311_v5  ;;  %v2312_v40 = vmax.f32 %v2280_v61, 0.0 }
 0x320   : > { %v2415_v12 = vmax.f32 %v2413_v0, %v2414_v7  ;;  %v2373_v13 = vmul.f32 %v2341_v6, %v2309_v8  ;;  %v2310_v14 = vmax.f32 %v2278_v43, 0.0  ;;  %v3267_v15 = vpop.f32.mrb[12].mxu1  ;;  %v2348_v6 = vld [vmem:[%s4127_s6 + $0x58] sm:$0xff] }
 0x321   : > { %v2406_v16 = vmax.f32 %v2404_v4, %v2405_v10  ;;  %v2429_v17 = vsel %vm2401_vm3, %v2375_v11, -inf  ;;  %v2376_v18 = vmul.f32 %v2344_v9, %v2312_v40  ;;  %v3317_v19 = vadd.f32 %v3267_v15, %v3831_v35  ;;  %v2139_v20 = vpop.f32.mrb[13].mxu1 }
 0x322   : > { %v2416_v21 = vrot.slane %v2415_v12, 2  ;;  %v2420_v22 = vsel %vm2401_vm3, %v2373_v13, -inf  ;;  %v2374_v23 = vmul.f32 %v2342_v34, %v2310_v14  ;;  %v3318_v28 = vadd.f32 %v2139_v20, %v3833_v36  ;;  %v3268_v29 = vpop.f32.mrb[14].mxu1 }
 0x323   : > { %v2407_v30 = vrot.slane %v2406_v16, 2  ;;  %v2430_v31 = vsel %vm2401_vm3, %v2376_v18, -inf  ;;  %v2283_v58 = vadd.f32 %v3317_v19, %v3898_v1  ;;  %v3319_v38 = vadd.f32 %v3268_v29, %v3835_v37  ;;  %v2142_v59 = vpop.f32.mrb[15].mxu1 }
 0x324   : > { %v2417_v60 = vmax.f32 %v2415_v12, %v2416_v21  ;;  %v2431_v62 = vmax.f32 %v2429_v17, %v2430_v31  ;;  %v2421_v35 = vsel %vm2401_vm3, %v2374_v23, -inf  ;;  %v2281_v36 = vadd.f32 %v3318_v28, %v3898_v1  ;;  %v2346_v17 = vld [vmem:[%s4127_s6 + $0x48] sm:$0xff] }
 0x325   : > { %v2408_v0 = vmax.f32 %v2406_v16, %v2407_v30  ;;  %v2422_v2 = vmax.f32 %v2420_v22, %v2421_v35  ;;  %v2315_v32 = vmax.f32 %v2283_v58, 0.0  ;;  %v2284_v37 = vadd.f32 %v3319_v38, %v3898_v1 }
 0x326   : > { %v2418_v33 = vrot.slane %v2417_v60, 1  ;;  %v2432_v4 = vrot.slane %v2431_v62, 4  ;;  %v2313_v5 = vmax.f32 %v2281_v36, 0.0  ;;  %v3320_v61 = vadd.f32 %v2142_v59, %v3837_v39 }
 0x327   : > { %v2409_v7 = vrot.slane %v2408_v0, 1  ;;  %v2423_v8 = vrot.slane %v2422_v2, 4  ;;  %v2379_v9 = vmul.f32 %v2347_v63, %v2315_v32  ;;  %v2316_v43 = vmax.f32 %v2284_v37, 0.0 }
 0x328   : > { %v2419_v10 = vmax.f32 %v2417_v60, %v2418_v33  ;;  %v2433_v11 = vmax.f32 %v2431_v62, %v2432_v4  ;;  %v2377_v40 = vmul.f32 %v2345_v3, %v2313_v5  ;;  %v2282_v34 = vadd.f32 %v3320_v61, %v3898_v1  ;;  %v3271_v12 = vpop.f32.mrb[16].mxu1 }
 0x329   : > { %v2410_v13 = vmax.f32 %v2408_v0, %v2409_v7  ;;  %v2424_v14 = vmax.f32 %v2422_v2, %v2423_v8  ;;  %v2447_v15 = vsel %vm2401_vm3, %v2379_v9, -inf  ;;  %v2380_v16 = vmul.f32 %v2348_v6, %v2316_v43  ;;  %v2155_v39 = vpop.f32.mrb[17].mxu1 }
 0x32a   : > { %v2547_v18 = vpack.c.bf16 %v2419_v10, %v2419_v10  ;;  %v2434_v19 = vrot.slane %v2433_v11, 2  ;;  %v2438_v20 = vsel %vm2401_vm3, %v2377_v40, -inf  ;;  %v2314_v21 = vmax.f32 %v2282_v34, 0.0  ;;  %v3272_v22 = vpop.f32.mrb[18].mxu1 }
 0x32b   : > { %v2546_v23 = vpack.c.bf16 %v2410_v13, %v2410_v13  ;;  %v2425_v28 = vrot.slane %v2424_v14, 2  ;;  %v2448_v29 = vsel %vm2401_vm3, %v2380_v16, -inf  ;;  %v3321_v30 = vadd.f32 %v3271_v12, %v3839_v41  ;;  %v2158_v31 = vpop.f32.mrb[19].mxu1  ;;  %v2351_v41 = vld [vmem:[%s4127_s6 + $0x70] sm:$0xff] }
 0x32c   : > { %v2598_v58 = vunpack.c.l.b16 %v2547_v18  ;;  %v2435_v38 = vmax.f32 %v2433_v11, %v2434_v19  ;;  %v2449_v59 = vmax.f32 %v2447_v15, %v2448_v29  ;;  %v2378_v60 = vmul.f32 %v2346_v17, %v2314_v21  ;;  %v2349_v11 = vld [vmem:[%s4127_s6 + $0x60] sm:$0xff] }
 0x32d   : > { %v2597_v62 = vunpack.c.l.b16 %v2546_v23  ;;  %v2426_v35 = vmax.f32 %v2424_v14, %v2425_v28  ;;  %v2287_v63 = vadd.f32 %v3321_v30, %v3898_v1  ;;  %v3322_v36 = vadd.f32 %v2155_v39, %v3841_v42 }
 0x32e   : > { %v2436_v0 = vrot.slane %v2435_v38, 1  ;;  %v2450_v2 = vrot.slane %v2449_v59, 4  ;;  %v2439_v32 = vsel %vm2401_vm3, %v2378_v60, -inf  ;;  %v3323_v3 = vadd.f32 %v3272_v22, %v3843_v44  ;;  %v2352_v44 = vld [vmem:[%s4127_s6 + $0x78] sm:$0xff] }
 0x32f   : > { %v2614_v37 = vsel %vm2613_vm5, %v2598_v58, %v2597_v62  ;;  %v2427_v33 = vrot.slane %v2426_v35, 1  ;;  %v2440_v4 = vmax.f32 %v2438_v20, %v2439_v32  ;;  %v2319_v5 = vmax.f32 %v2287_v63, 0.0 }
 0x330   : > { %v2437_v6 = vmax.f32 %v2435_v38, %v2436_v0  ;;  %v2451_v61 = vmax.f32 %v2449_v59, %v2450_v2  ;;  %v2285_v7 = vadd.f32 %v3322_v36, %v3898_v1  ;;  %v2288_v42 = vadd.f32 %v3323_v3, %v3898_v1  ;;  %v3275_v8 = vpop.f32.mrb[20].mxu1 }
 0x331   : > { %v2428_v9 = vmax.f32 %v2426_v35, %v2427_v33  ;;  %v2441_v43 = vrot.slane %v2440_v4, 4  ;;  %v2383_v10 = vmul.f32 %v2351_v41, %v2319_v5  ;;  %v3324_v40 = vadd.f32 %v2158_v31, %v3845_v45  ;;  %v2171_v34 = vpop.f32.mrb[21].mxu1  ;;  %v2350_v45 = vld [vmem:[%s4127_s6 + $0x68] sm:$0xff] }
 0x332   : > { %v2549_v12 = vpack.c.bf16 %v2437_v6, %v2437_v6  ;;  %v2452_v13 = vrot.slane %v2451_v61, 2  ;;  %v2317_v14 = vmax.f32 %v2285_v7, 0.0  ;;  %v2320_v15 = vmax.f32 %v2288_v42, 0.0  ;;  %v3276_v16 = vpop.f32.mrb[22].mxu1 }
 0x333   : > { %v2548_v17 = vpack.c.bf16 %v2428_v9, %v2428_v9  ;;  %v2442_v39 = vmax.f32 %v2440_v4, %v2441_v43  ;;  %v2465_v18 = vsel %vm2401_vm3, %v2383_v10, -inf  ;;  %v2286_v19 = vadd.f32 %v3324_v40, %v3898_v1  ;;  %v2174_v20 = vpop.f32.mrb[23].mxu1 }
 0x334   : > { %v2600_v21 = vunpack.c.l.b16 %v2549_v12  ;;  %v2453_v22 = vmax.f32 %v2451_v61, %v2452_v13  ;;  %v2381_v23 = vmul.f32 %v2349_v11, %v2317_v14  ;;  %v2384_v28 = vmul.f32 %v2352_v44, %v2320_v15  ;;  %v2353_v11 = vld [vmem:[%s4127_s6 + $0x80] sm:$0xff]  ;;  %v2356_v14 = vld [vmem:[%s4127_s6 + $0x98] sm:$0xff] }
 0x335   : > { %v2599_v29 = vunpack.c.l.b16 %v2548_v17  ;;  %v2443_v30 = vrot.slane %v2442_v39, 2  ;;  %v2318_v31 = vmax.f32 %v2286_v19, 0.0  ;;  %v3325_v58 = vadd.f32 %v3275_v8, %v3847_v46 }
 0x336   : > { %v2454_v38 = vrot.slane %v2453_v22, 1  ;;  %v2456_v59 = vsel %vm2401_vm3, %v2381_v23, -inf  ;;  %v2466_v60 = vsel %vm2401_vm3, %v2384_v28, -inf  ;;  %v3326_v62 = vadd.f32 %v2171_v34, %v3849_v47  ;;  %v2355_v47 = vld [vmem:[%s4127_s6 + $0x90] sm:$0xff] }
 0x337   : > { %v2616_v35 = vsel %vm2615_vm6, %v2599_v29, %v2614_v37  ;;  %v2444_v63 = vmax.f32 %v2442_v39, %v2443_v30  ;;  %v2467_v36 = vmax.f32 %v2465_v18, %v2466_v60  ;;  %v2382_v0 = vmul.f32 %v2350_v45, %v2318_v31 }
 0x338   : > { %v2455_v2 = vmax.f32 %v2453_v22, %v2454_v38  ;;  %v2618_v32 = vsel %vm2617_vm7, %v2600_v21, %v2616_v35  ;;  %v2291_v41 = vadd.f32 %v3325_v58, %v3898_v1  ;;  %v2289_v46 = vadd.f32 %v3326_v62, %v3898_v1  ;;  %v3279_v3 = vpop.f32.mrb[24].mxu1 }
 0x339   : > { %v2445_v33 = vrot.slane %v2444_v63, 1  ;;  %v2468_v4 = vrot.slane %v2467_v36, 4  ;;  %v2457_v5 = vsel %vm2401_vm3, %v2382_v0, -inf  ;;  %v3327_v37 = vadd.f32 %v3276_v16, %v3851_v48  ;;  %v2187_v6 = vpop.f32.mrb[25].mxu1 }
 0x33a   : > { %v2551_v61 = vpack.c.bf16 %v2455_v2, %v2455_v2  ;;  %v2458_v7 = vmax.f32 %v2456_v59, %v2457_v5  ;;  %v2323_v42 = vmax.f32 %v2291_v41, 0.0  ;;  %v2321_v8 = vmax.f32 %v2289_v46, 0.0  ;;  %v3280_v9 = vpop.f32.mrb[26].mxu1 }
 0x33b   : > { %v2446_v43 = vmax.f32 %v2444_v63, %v2445_v33  ;;  %v2469_v10 = vmax.f32 %v2467_v36, %v2468_v4  ;;  %v2292_v44 = vadd.f32 %v3327_v37, %v3898_v1  ;;  %v3328_v40 = vadd.f32 %v2174_v20, %v3853_v49  ;;  %v2190_v34 = vpop.f32.mrb[27].mxu1  ;;  %v2354_v49 = vld [vmem:[%s4127_s6 + $0x88] sm:$0xff] }
 0x33c   : > { %v2602_v12 = vunpack.c.l.b16 %v2551_v61  ;;  %v2459_v13 = vrot.slane %v2458_v7, 4  ;;  %v2387_v48 = vmul.f32 %v2355_v47, %v2323_v42  ;;  %v2385_v21 = vmul.f32 %v2353_v11, %v2321_v8  ;;  %v2360_v61 = vld [vmem:[%s4127_s6 + $0xb8] sm:$0xff] }
 0x33d   : > { %v2550_v15 = vpack.c.bf16 %v2446_v43, %v2446_v43  ;;  %v2470_v16 = vrot.slane %v2469_v10, 2  ;;  %v2324_v17 = vmax.f32 %v2292_v44, 0.0  ;;  %v2290_v39 = vadd.f32 %v3328_v40, %v3898_v1 }
 0x33e   : > { %v2460_v18 = vmax.f32 %v2458_v7, %v2459_v13  ;;  %v2483_v19 = vsel %vm2401_vm3, %v2387_v48, -inf  ;;  %v3329_v20 = vadd.f32 %v3279_v3, %v3855_v50  ;;  %v3330_v31 = vadd.f32 %v2187_v6, %v3857_v51  ;;  %v2359_v50 = vld [vmem:[%s4127_s6 + $0xb0] sm:$0xff]  ;;  %v2357_v6 = vld [vmem:[%s4127_s6 + $0xa0] sm:$0xff] }
 0x33f   : > { %v2601_v22 = vunpack.c.l.b16 %v2550_v15  ;;  %v2471_v23 = vmax.f32 %v2469_v10, %v2470_v16  ;;  %v2388_v28 = vmul.f32 %v2356_v14, %v2324_v17  ;;  %v2322_v45 = vmax.f32 %v2290_v39, 0.0  ;;  %v2358_v16 = vld [vmem:[%s4127_s6 + $0xa8] sm:$0xff] }
 0x340   : > { %v2461_v29 = vrot.slane %v2460_v18, 2  ;;  %v2295_v30 = vadd.f32 %v3329_v20, %v3898_v1  ;;  %v3331_v58 = vadd.f32 %v3280_v9, %v3859_v52  ;;  %v3283_v38 = vpop.f32.mrb[28].mxu1  ;;  %v2474_v52 = vsel %vm2401_vm3, %v2385_v21, -inf }
 0x341   : > { %v2620_v59 = vsel %vm2619_vm8, %v2601_v22, %v2618_v32  ;;  %v2472_v60 = vrot.slane %v2471_v23, 1  ;;  %v2484_v62 = vsel %vm2401_vm3, %v2388_v28, -inf  ;;  %v2386_v35 = vmul.f32 %v2354_v49, %v2322_v45  ;;  %v2203_v63 = vpop.f32.mrb[29].mxu1 }
 0x342   : > { %v2462_v36 = vmax.f32 %v2460_v18, %v2461_v29  ;;  %v2622_v0 = vsel %vm2621_vm9, %v2602_v12, %v2620_v59  ;;  %v2485_v2 = vmax.f32 %v2483_v19, %v2484_v62  ;;  %v2327_v41 = vmax.f32 %v2295_v30, 0.0  ;;  %v3284_v51 = vpop.f32.mrb[30].mxu1 }
 0x343   : > { %v2475_v46 = vsel %vm2401_vm3, %v2386_v35, -inf  ;;  %v2293_v32 = vadd.f32 %v3330_v31, %v3898_v1  ;;  %v2296_v3 = vadd.f32 %v3331_v58, %v3898_v1  ;;  %v2206_v33 = vpop.f32.mrb[31].mxu1  ;;  %v3332_v8 = vadd.f32 %v2190_v34, %v3861_v53 }
 0x344   : > { %v2463_v4 = vrot.slane %v2462_v36, 1  ;;  %v2486_v5 = vrot.slane %v2485_v2, 4  ;;  %v2476_v47 = vmax.f32 %v2474_v52, %v2475_v46  ;;  %v2391_v37 = vmul.f32 %v2359_v50, %v2327_v41 }
 0x345   : > { %v2325_v7 = vmax.f32 %v2293_v32, 0.0  ;;  %v2328_v42 = vmax.f32 %v2296_v3, 0.0  ;;  %v4037_v9 = vmax.f32 %v2471_v23, %v2472_v60  ;;  %v2294_v13 = vadd.f32 %v3332_v8, %v3898_v1  ;;  %v2363_v60 = vld [vmem:[%s4127_s6 + $0xd0] sm:$0xff] }
 0x346   : > { %v2464_v43 = vmax.f32 %v2462_v36, %v2463_v4  ;;  %v2487_v10 = vmax.f32 %v2485_v2, %v2486_v5  ;;  %v2477_v11 = vrot.slane %v2476_v47, 4  ;;  %v2501_v44 = vsel %vm2401_vm3, %v2391_v37, -inf }
 0x347   : > { %v2389_v40 = vmul.f32 %v2357_v6, %v2325_v7  ;;  %v2392_v12 = vmul.f32 %v2360_v61, %v2328_v42  ;;  %v3333_v53 = vadd.f32 %v3283_v38, %v3863_v54  ;;  %v2326_v18 = vmax.f32 %v2294_v13, 0.0 }
 0x348   : > { %v2552_v48 = vpack.c.bf16 %v2464_v43, %v2464_v43  ;;  %v2488_v14 = vrot.slane %v2487_v10, 2  ;;  %v2478_v15 = vmax.f32 %v2476_v47, %v2477_v11  ;;  %v3287_v34 = vpop.f32.mrb[0].mxu1  ;;  %v3334_v19 = vadd.f32 %v2203_v63, %v3865_v55 }
 0x349   : > { %v2492_v17 = vsel %vm2401_vm3, %v2389_v40, -inf  ;;  %v2502_v39 = vsel %vm2401_vm3, %v2392_v12, -inf  ;;  %v2219_v21 = vpop.f32.mrb[1].mxu1  ;;  %v2390_v45 = vmul.f32 %v2358_v16, %v2326_v18  ;;  %v2299_v29 = vadd.f32 %v3333_v53, %v3898_v1 }
 0x34a   : > { %v2603_v49 = vunpack.c.l.b16 %v2552_v48  ;;  %v2489_v20 = vmax.f32 %v2487_v10, %v2488_v14  ;;  %v2479_v22 = vrot.slane %v2478_v15, 2  ;;  %v2503_v23 = vmax.f32 %v2501_v44, %v2502_v39  ;;  %v3288_v28 = vpop.f32.mrb[2].mxu1 }
 0x34b   : > { %v2297_v30 = vadd.f32 %v3334_v19, %v3898_v1  ;;  %v3335_v54 = vadd.f32 %v3284_v51, %v3867_v56  ;;  %v2222_v31 = vpop.f32.mrb[3].mxu1  ;;  %v2493_v62 = vsel %vm2401_vm3, %v2390_v45, -inf  ;;  %v2331_v35 = vmax.f32 %v2299_v29, 0.0  ;;  %v2364_v51 = vld [vmem:[%s4127_s6 + $0xd8] sm:$0xff] }
 0x34c   : > { %v4052_v58 = vsel %vm2623_vm10, %v2603_v49, %v2622_v0  ;;  %v2490_v38 = vrot.slane %v2489_v20, 1  ;;  %v2480_v59 = vmax.f32 %v2478_v15, %v2479_v22  ;;  %v2504_v55 = vrot.slane %v2503_v23, 4  ;;  %v2361_v0 = vld [vmem:[%s4127_s6 + $0xc0] sm:$0xff] }
 0x34d   : > { %v2329_v50 = vmax.f32 %v2297_v30, 0.0  ;;  %v2300_v63 = vadd.f32 %v3335_v54, %v3898_v1  ;;  %v2494_v41 = vmax.f32 %v2492_v17, %v2493_v62  ;;  %v2553_v52 = vpack.c.bf16 %v4037_v9, %v4037_v9  ;;  %v2362_v9 = vld [vmem:[%s4127_s6 + $0xc8] sm:$0xff]  ;;  %v2365_v62 = vld [vmem:[%s4127_s6 + $0xe0] sm:$0xff] }
 0x34e   : > { %v2491_v36 = vmax.f32 %v2489_v20, %v2490_v38  ;;  %v2481_v2 = vrot.slane %v2480_v59, 1  ;;  %v2505_v56 = vmax.f32 %v2503_v23, %v2504_v55  ;;  %v2395_v46 = vmul.f32 %v2363_v60, %v2331_v35 }
 0x34f   : > { %v2332_v32 = vmax.f32 %v2300_v63, 0.0  ;;  %v3336_v3 = vadd.f32 %v2206_v33, %v3869_v57  ;;  %v2495_v37 = vrot.slane %v2494_v41, 4  ;;  %v2393_v61 = vmul.f32 %v2361_v0, %v2329_v50 }
 0x350   : > { %v2555_v4 = vpack.c.bf16 %v2491_v36, %v2491_v36  ;;  %v2482_v5 = vmax.f32 %v2480_v59, %v2481_v2  ;;  %v2506_v47 = vrot.slane %v2505_v56, 2  ;;  %v2519_v6 = vsel %vm2401_vm3, %v2395_v46, -inf }
 0x351   : > { %v2396_v7 = vmul.f32 %v2364_v51, %v2332_v32  ;;  %v2298_v42 = vadd.f32 %v3336_v3, %v3898_v1  ;;  %v2496_v11 = vmax.f32 %v2494_v41, %v2495_v37  ;;  %v3337_v44 = vadd.f32 %v3287_v34, %v3815_v24  ;;  %v2367_v24 = vld [vmem:[%s4127_s6 + $0xf0] sm:$0xff]  ;;  %v2366_v41 = vld [vmem:[%s4127_s6 + $0xe8] sm:$0xff] }
 0x352   : > { %v2606_v8 = vunpack.c.l.b16 %v2555_v4  ;;  %v2554_v43 = vpack.c.bf16 %v2482_v5, %v2482_v5  ;;  %v2507_v10 = vmax.f32 %v2505_v56, %v2506_v47  ;;  %v3338_v40 = vadd.f32 %v2219_v21, %v3817_v25 }
 0x353   : > { %v2520_v57 = vsel %vm2401_vm3, %v2396_v7, -inf  ;;  %v2330_v33 = vmax.f32 %v2298_v42, 0.0  ;;  %v2497_v48 = vrot.slane %v2496_v11, 2  ;;  %v2303_v16 = vadd.f32 %v3337_v44, %v3898_v1 }
 0x354   : > { %v2605_v12 = vunpack.c.l.b16 %v2554_v43  ;;  %v2508_v13 = vrot.slane %v2507_v10, 1  ;;  %v2521_v14 = vmax.f32 %v2519_v6, %v2520_v57  ;;  %v2301_v53 = vadd.f32 %v3338_v40, %v3898_v1 }
 0x355   : > { %v2394_v15 = vmul.f32 %v2362_v9, %v2330_v33  ;;  %v3339_v17 = vadd.f32 %v3288_v28, %v3819_v26  ;;  %v2498_v18 = vmax.f32 %v2496_v11, %v2497_v48  ;;  %v2510_v19 = vsel %vm2401_vm3, %v2393_v61, -inf  ;;  %v2368_v26 = vld [vmem:[%s4127_s6 + $0xf8] sm:$0xff] }
 0x356   : > { %v2627_v39 = vsel %vm2613_vm5, %v2606_v8, %v2605_v12  ;;  %v2522_v49 = vrot.slane %v2521_v14, 4  ;;  %v2509_v25 = vmax.f32 %v2507_v10, %v2508_v13  ;;  %v2335_v21 = vmax.f32 %v2303_v16, 0.0 }
 0x357   : > { %v2511_v34 = vsel %vm2401_vm3, %v2394_v15, -inf  ;;  %v2304_v20 = vadd.f32 %v3339_v17, %v3898_v1  ;;  %v2499_v22 = vrot.slane %v2498_v18, 1  ;;  %v2333_v29 = vmax.f32 %v2301_v53, 0.0 }
 0x358   : > { %v2523_v23 = vmax.f32 %v2521_v14, %v2522_v49  ;;  %v2512_v45 = vmax.f32 %v2510_v19, %v2511_v34  ;;  %v2399_v28 = vmul.f32 %v2367_v24, %v2335_v21  ;;  %v3340_v54 = vadd.f32 %v2222_v31, %v3821_v27 }
 0x359   : > { %v2336_v30 = vmax.f32 %v2304_v20, 0.0  ;;  %v2604_v38 = vunpack.c.l.b16 %v2553_v52  ;;  %v2500_v59 = vmax.f32 %v2498_v18, %v2499_v22  ;;  %v2557_v35 = vpack.c.bf16 %v2509_v25, %v2509_v25 }
 0x35a   : > { %v2524_v55 = vrot.slane %v2523_v23, 2  ;;  %v2513_v60 = vrot.slane %v2512_v45, 4  ;;  %v2302_v63 = vadd.f32 %v3340_v54, %v3898_v1  ;;  %v2537_v31 = vsel %vm2401_vm3, %v2399_v28, -inf }
 0x35b   : > { %v2400_v50 = vmul.f32 %v2368_v26, %v2336_v30  ;;  %v2556_v36 = vpack.c.bf16 %v2500_v59, %v2500_v59  ;;  %v2626_v27 = vsel %vm2625_vm11, %v2604_v38, %v4052_v58  ;;  %v2397_v0 = vmul.f32 %v2365_v62, %v2333_v29 }
 0x35c   : > { %v2525_v2 = vmax.f32 %v2523_v23, %v2524_v55  ;;  %v2514_v56 = vmax.f32 %v2512_v45, %v2513_v60  ;;  %v2334_v52 = vmax.f32 %v2302_v63, 0.0  ;;  %v2608_v4 = vunpack.c.l.b16 %v2557_v35  ;;  %v2942_v23 = vld [vmem:[%s4126_s5] ss:$0 sm:$0xff] }
 0x35d   : > { %v2538_v51 = vsel %vm2401_vm3, %v2400_v50, -inf  ;;  %v2607_v46 = vunpack.c.l.b16 %v2556_v36  ;;  %v2528_v58 = vsel %vm2401_vm3, %v2397_v0, -inf }
 0x35e   : > { %v2526_v32 = vrot.slane %v2525_v2, 1  ;;  %v2515_v3 = vrot.slane %v2514_v56, 2  ;;  %v2539_v1 = vmax.f32 %v2537_v31, %v2538_v51  ;;  %v2398_v5 = vmul.f32 %v2366_v41, %v2334_v52 }
 0x35f   : > { %v2628_v47 = vsel %vm2615_vm6, %v2607_v46, %v2627_v39 }
 0x360   : > { %v2516_v37 = vmax.f32 %v2514_v56, %v2515_v3  ;;  %v2540_v6 = vrot.slane %v2539_v1, 4  ;;  %v2527_v61 = vmax.f32 %v2525_v2, %v2526_v32  ;;  %v2629_v7 = vsel %vm2617_vm7, %v2608_v4, %v2628_v47 }
 0x361   : > { %v2529_v42 = vsel %vm2401_vm3, %v2398_v5, -inf }
 0x362   : > { %v2517_v8 = vrot.slane %v2516_v37, 1  ;;  %v2541_v43 = vmax.f32 %v2539_v1, %v2540_v6  ;;  %v2530_v10 = vmax.f32 %v2528_v58, %v2529_v42  ;;  %v2559_v33 = vpack.c.bf16 %v2527_v61, %v2527_v61 }
 0x364   : > { %v2518_v11 = vmax.f32 %v2516_v37, %v2517_v8  ;;  %v2542_v9 = vrot.slane %v2541_v43, 2  ;;  %v2531_v57 = vrot.slane %v2530_v10, 4  ;;  %v2610_v15 = vunpack.c.l.b16 %v2559_v33 }
 0x366   : > { %v2558_v44 = vpack.c.bf16 %v2518_v11, %v2518_v11  ;;  %v2543_v40 = vmax.f32 %v2541_v43, %v2542_v9  ;;  %v2532_v12 = vmax.f32 %v2530_v10, %v2531_v57 }
 0x368   : > { %v2609_v13 = vunpack.c.l.b16 %v2558_v44  ;;  %v2544_v48 = vrot.slane %v2543_v40, 1  ;;  %v2533_v14 = vrot.slane %v2532_v12, 2 }
 0x36a   : > { %v2630_v16 = vsel %vm2619_vm8, %v2609_v13, %v2629_v7  ;;  %v2534_v53 = vmax.f32 %v2532_v12, %v2533_v14  ;;  %v2545_v17 = vmax.f32 %v2543_v40, %v2544_v48 }
 0x36b   : > { %v2631_v39 = vsel %vm2621_vm9, %v2610_v15, %v2630_v16 }
 0x36c   : > { %v2535_v18 = vrot.slane %v2534_v53, 1  ;;  %v2561_v49 = vpack.c.bf16 %v2545_v17, %v2545_v17 }
 0x36e   : > { %v2536_v19 = vmax.f32 %v2534_v53, %v2535_v18  ;;  %v2612_v34 = vunpack.c.l.b16 %v2561_v49 }
 0x370   : > { %v2560_v24 = vpack.c.bf16 %v2536_v19, %v2536_v19 }
 0x372   : > { %v2611_v25 = vunpack.c.l.b16 %v2560_v24 }
 0x374   : > { %v2632_v21 = vsel %vm2623_vm10, %v2611_v25, %v2631_v39 }
 0x375   : > { %v2633_v20 = vsel %vm2625_vm11, %v2612_v34, %v2632_v21 }
 0x376   : > { %v2634_v22 = vpack.c.b16 %v2633_v20, %v2626_v27 }
 0x378   : > { %3302 = vmatmul.mubr.msk.bf16.vlgmr.msra.gmra.mrb[64].mxu0 %vm2401_vm3, %v2634_v22 }
 0x44b   : > { %v2708_v45 = vpop.f32.mrb[64].mxu0 }
 0x44c   : > { %v2709_v26 = vadd.f32 %v2942_v23, %v2708_v45  ;;  %v3303_v28 = vpop.f32.mrb[65].mxu0 }
 0x44d   : > { %v2711_v29 = vpop.f32.mrb[66].mxu0 }
 0x44e   : > { %2716 = vst.msk [vmem:[%s280_s15] sm:$0xff] %vm2715_vm12, %v2709_v26  ;;  %v2712_v30 = vadd.f32 %v2942_v23, %v2711_v29  ;;  %v3304_v54 = vpop.f32.mrb[67].mxu0 }
 0x450   : > { %2717 = vst.msk [vmem:[%s280_s15 + $0x8] sm:$0xff] %vm2715_vm12, %v2712_v30 }
 0x451 PF: > { %s17_s24 = sadd.s32 1, %s3476_s24  }
 0x452   : > { %p14_p5 = scmp.ge.s32.totalorder %s17_s24, 4  }
 0x454   :  { %16 = sbr.rel (!%p14_p5) target bundleno = 1 (0x1), region = 82 }

</bundles_post_ra>
